<compile_context>
chip_gen: v7x
topology: tpu7x:2x2x1
jax: 0.10.0
libtpu: 0.0.40
codegen_flags: <defaults>
</compile_context>

<pallas_src>
import functools

import jax
import jax.numpy as jnp
from jax.experimental import pallas as pl
from jax.experimental.pallas import tpu as pltpu

LANE = 128  # out-channel padding target for the MXU-facing weight operand


def _apply_act(x, act):
    if act == "relu":
        return jnp.maximum(x, 0.0)
    if act == "sigmoid":
        return jax.nn.sigmoid(x)
    return x


# ----------------------------------------------------------------------------
# Pallas kernels
# ----------------------------------------------------------------------------
def _mm_bias_act_kernel(x_ref, w_ref, b_ref, o_ref, *, act, n_out):
    # (tm, K) @ (K, 128) -> f32 (tm, 128); bias; slice off the structural pad
    # BEFORE activation/store so only the true cout columns hit HBM.
    acc = jnp.dot(x_ref[...], w_ref[...], preferred_element_type=jnp.float32)
    acc = (acc + b_ref[...])[:, :n_out]
    o_ref[...] = _apply_act(acc, act).astype(o_ref.dtype)


def _choose_tm(m, cap=1024):
    """Row tile: largest multiple-of-8 divisor of m that is <= cap and gives
    >= 2 grid programs (v7x has 2 TensorCores); falls back gracefully."""
    if m <= 8:
        return m
    hi = min(cap, m)
    single = None
    for d in range(hi, 7, -1):
        if m % d == 0 and d % 8 == 0:
            if m // d >= 2:
                return d
            if single is None:
                single = d
    return single if single is not None else hi


def matmul_bias_act(patches, w, b, *, n_out, act, out_dtype):
    """(M, K) x (K, 128-padded) + bias -> (M, n_out) fused activation.

    Weight/bias stay 128-padded in VMEM for clean MXU layout; the HBM output
    is the true (M, n_out) in `out_dtype` (bf16 for intermediate layers)."""
    M, K = patches.shape
    Kw, Np = w.shape
    assert K == Kw and Np % LANE == 0 and n_out <= Np, (K, Kw, Np, n_out)
    tm = _choose_tm(M)
    return pl.pallas_call(
        functools.partial(_mm_bias_act_kernel, act=act, n_out=n_out),
        out_shape=jax.ShapeDtypeStruct((M, n_out), out_dtype),
        grid=(pl.cdiv(M, tm),),
        in_specs=[
            pl.BlockSpec((tm, K), lambda i: (i, 0)),   # streamed / pipelined
            pl.BlockSpec((K, Np), lambda i: (0, 0)),   # VMEM-resident weight
            pl.BlockSpec((1, Np), lambda i: (0, 0)),   # VMEM-resident bias
        ],
        out_specs=pl.BlockSpec((tm, n_out), lambda i: (i, 0)),
        compiler_params=pltpu.CompilerParams(dimension_semantics=("parallel",)),
    )(patches.astype(jnp.bfloat16), w, b)


def _bottleneck_kernel(x_ref, w3_ref, b3_ref, w4_ref, b4_ref, o_ref):
    # enc3: Conv2d(32, 64, 7) over the full 7x7 map == plain matmul.
    # NOTE: the PyTorch encoder has NO activation after this conv (Sequential
    # ends with the Conv2d), matching the original module.
    h = jnp.dot(x_ref[...], w3_ref[...], preferred_element_type=jnp.float32)
    h = h + b3_ref[...]
    # dec1: ConvTranspose2d(64, 32, 7) on a 1x1 map == plain matmul + ReLU.
    y = jnp.dot(h.astype(jnp.bfloat16), w4_ref[...],
                preferred_element_type=jnp.float32)
    o_ref[...] = jnp.maximum(y + b4_ref[...], 0.0).astype(o_ref.dtype)


def bottleneck_fused(x_flat, w3, b3, w4, b4):
    """Fused enc3 + dec1: (B, 1568) -> (B, 1568) bf16; batch-tiled grid so the
    work can be split across TensorCores and VMEM stays bounded at large B."""
    M, K = x_flat.shape
    _, Nmid = w3.shape          # 64 (true width, zero columns trimmed)
    _, Nout = w4.shape          # 1568
    tm = _choose_tm(M, cap=512)
    return pl.pallas_call(
        _bottleneck_kernel,
        out_shape=jax.ShapeDtypeStruct((M, Nout), jnp.bfloat16),
        grid=(pl.cdiv(M, tm),),
        in_specs=[
            pl.BlockSpec((tm, K), lambda i: (i, 0)),
            pl.BlockSpec((K, Nmid), lambda i: (0, 0)),
            pl.BlockSpec((1, Nmid), lambda i: (0, 0)),
            pl.BlockSpec((Nmid, Nout), lambda i: (0, 0)),
            pl.BlockSpec((1, Nout), lambda i: (0, 0)),
        ],
        out_specs=pl.BlockSpec((tm, Nout), lambda i: (i, 0)),
        compiler_params=pltpu.CompilerParams(dimension_semantics=("parallel",)),
    )(x_flat.astype(jnp.bfloat16), w3, b3, w4, b4)


# ----------------------------------------------------------------------------
# XLA glue (gathers / reshapes only; all FLOPs are in the kernels above)
# ----------------------------------------------------------------------------
def _im2col_nhwc(x, kh, kw, stride, pad):
    """x: (B, H, W, C) -> patches (B*Ho*Wo, kh*kw*C), K-order (kh, kw, C)."""
    B, H, W, C = x.shape
    xp = jnp.pad(x, ((0, 0), (pad, pad), (pad, pad), (0, 0)))
    Ho = (H + 2 * pad - kh) // stride + 1
    Wo = (W + 2 * pad - kw) // stride + 1
    cols = []
    for i in range(kh):
        for j in range(kw):
            cols.append(xp[:, i:i + stride * Ho:stride, j:j + stride * Wo:stride, :])
    cols = jnp.stack(cols, axis=3)                      # (B, Ho, Wo, kh*kw, C)
    return cols.reshape(B * Ho * Wo, kh * kw * C), Ho, Wo


def _conv_block(x_nhwc, w_flat, b_flat, *, k, stride, pad, cout, act, out_dtype):
    patches, Ho, Wo = _im2col_nhwc(x_nhwc, k, k, stride, pad)
    out = matmul_bias_act(patches, w_flat, b_flat, n_out=cout, act=act,
                          out_dtype=out_dtype)
    return out.reshape(x_nhwc.shape[0], Ho, Wo, cout)


def _convT_phase_block(x_nhwc, w_flat, b_flat, *, cout, act, out_dtype):
    """ConvTranspose2d(k=3, stride=2, pad=1, out_pad=1) via sub-pixel phases:
    2x2 windows over the un-dilated input (padded right/bottom by one zero)
    hit a (4*Ci, 4*Co) phase weight; depth-to-space rebuilds the 2x output."""
    B, H, W, C = x_nhwc.shape
    xp = jnp.pad(x_nhwc, ((0, 0), (0, 1), (0, 1), (0, 0)))
    cols = [xp[:, dy:dy + H, dx:dx + W, :] for dy in (0, 1) for dx in (0, 1)]
    patches = jnp.stack(cols, axis=3).reshape(B * H * W, 4 * C)
    out = matmul_bias_act(patches, w_flat, b_flat, n_out=4 * cout, act=act,
                          out_dtype=out_dtype)
    y = out.reshape(B, H, W, 2, 2, cout).transpose(0, 1, 3, 2, 4, 5)
    return y.reshape(B, 2 * H, 2 * W, cout)


# ----------------------------------------------------------------------------
# Parameters: PyTorch-layout raw weights (for the reference) plus pre-flattened
# / padded / bf16 weights for the Pallas hot path (all transforms hoisted here).
# ----------------------------------------------------------------------------
def _uniform(key, shape, bound):
    return jax.random.uniform(key, shape, jnp.float32, -bound, bound)


def _pad_cols(a, n):
    return jnp.pad(a, ((0, 0), (0, n - a.shape[1])))


def _flat_conv(w, b):
    """Conv2d weight (O, I, kh, kw) -> (kh*kw*I, 128) bf16 + (1, 128) f32."""
    o, i, kh, kw = w.shape
    wf = w.transpose(2, 3, 1, 0).reshape(kh * kw * i, o)
    return (_pad_cols(wf, LANE).astype(jnp.bfloat16),
            _pad_cols(b.reshape(1, o), LANE))


def _convT_phase_weight(w, b):
    """ConvTranspose2d (Ci, Co, 3, 3), stride=2, pad=1, out_pad=1 ->
    phase weight (4*Ci, 128) bf16 (row order (dy, dx, ci), col order
    (py, px, co), true cols = 4*Co) + (1, 128) f32 bias."""
    Ci, Co, kh, kw = w.shape
    assert (kh, kw) == (3, 3)
    # For output phase p and input tap d (0 = same index, 1 = next index),
    # the contributing kernel index; (0, 1) has no contribution.
    sel = {(0, 0): 1, (1, 0): 2, (1, 1): 0}
    wf = jnp.zeros((2, 2, Ci, 2, 2, Co), jnp.float32)   # (dy, dx, ci, py, px, co)
    for py in (0, 1):
        for px in (0, 1):
            for dy in (0, 1):
                for dx in (0, 1):
                    if (py, dy) in sel and (px, dx) in sel:
                        wf = wf.at[dy, dx, :, py, px, :].set(
                            w[:, :, sel[(py, dy)], sel[(px, dx)]])
    wf = _pad_cols(wf.reshape(4 * Ci, 4 * Co), LANE).astype(jnp.bfloat16)
    bf = _pad_cols(jnp.tile(b, 4).reshape(1, 4 * Co), LANE)
    return wf, bf


def init_params(key):
    ks = jax.random.split(key, 12)

    def conv_raw(kw_, kb_, o, i, k):
        bound = 1.0 / (i * k * k) ** 0.5
        return _uniform(kw_, (o, i, k, k), bound), _uniform(kb_, (o,), bound)

    def convT_raw(kw_, kb_, i, o, k):
        bound = 1.0 / (i * k * k) ** 0.5
        return _uniform(kw_, (i, o, k, k), bound), _uniform(kb_, (o,), bound)

    raw = {
        "enc1": conv_raw(ks[0], ks[1], 16, 1, 3),
        "enc2": conv_raw(ks[2], ks[3], 32, 16, 3),
        "enc3": conv_raw(ks[4], ks[5], 64, 32, 7),
        "dec1": convT_raw(ks[6], ks[7], 64, 32, 7),
        "dec2": convT_raw(ks[8], ks[9], 32, 16, 3),
        "dec3": convT_raw(ks[10], ks[11], 16, 1, 3),
    }

    # Fused bottleneck weights, trimmed to the true 64-wide inner dim.
    w3, b3 = raw["enc3"]                       # (64, 32, 7, 7) Conv2d layout
    w4, b4 = raw["dec1"]                       # (64, 32, 7, 7) ConvT (I, O, k, k)
    w3f = w3.transpose(2, 3, 1, 0).reshape(49 * 32, 64).astype(jnp.bfloat16)
    b3f = b3.reshape(1, 64)
    w4f = w4.transpose(0, 2, 3, 1).reshape(64, 49 * 32).astype(jnp.bfloat16)
    b4f = jnp.tile(b4, 49).reshape(1, 49 * 32)

    return {
        "raw": raw,
        "enc1": _flat_conv(*raw["enc1"]),
        "enc2": _flat_conv(*raw["enc2"]),
        "bottleneck": (w3f, b3f, w4f, b4f),
        "dec2": _convT_phase_weight(*raw["dec2"]),
        "dec3": _convT_phase_weight(*raw["dec3"]),
    }


# ----------------------------------------------------------------------------
# Forward pass (Pallas) and independent XLA reference
# ----------------------------------------------------------------------------
def autoencoder_forward(params, x):
    """x: (B, 1, 28, 28) NCHW f32 -> (B, 1, 28, 28) NCHW f32."""
    B = x.shape[0]
    h = x.transpose(0, 2, 3, 1)                                  # (B,28,28,1)
    h = _conv_block(h, *params["enc1"], k=3, stride=2, pad=1, cout=16,
                    act="relu", out_dtype=jnp.bfloat16)          # (B,14,14,16)
    h = _conv_block(h, *params["enc2"], k=3, stride=2, pad=1, cout=32,
                    act="relu", out_dtype=jnp.bfloat16)          # (B,7,7,32)
    w3, b3, w4, b4 = params["bottleneck"]
    z = bottleneck_fused(h.reshape(B, 7 * 7 * 32), w3, b3, w4, b4)
    h = z.reshape(B, 7, 7, 32)                                   # (B,7,7,32)
    h = _convT_phase_block(h, *params["dec2"], cout=16, act="relu",
                           out_dtype=jnp.bfloat16)               # (B,14,14,16)
    h = _convT_phase_block(h, *params["dec3"], cout=1, act="sigmoid",
                           out_dtype=jnp.float32)                # (B,28,28,1)
    return h.transpose(0, 3, 1, 2)


def _conv_ref(x, w, b, stride, pad):
    w_hwio = jnp.transpose(w, (2, 3, 1, 0)).astype(jnp.bfloat16)
    y = jax.lax.conv_general_dilated(
        x.astype(jnp.bfloat16), w_hwio, (stride, stride),
        [(pad, pad), (pad, pad)],
        dimension_numbers=("NHWC", "HWIO", "NHWC"),
        preferred_element_type=jnp.float32)
    return y + b.reshape(1, 1, 1, -1)


def _convT_ref(x, w, b, stride, pad, out_pad):
    k = w.shape[2]
    w_eff = jnp.flip(w, (2, 3)).transpose(1, 0, 2, 3)            # (O, I, kh, kw)
    w_hwio = jnp.transpose(w_eff, (2, 3, 1, 0)).astype(jnp.bfloat16)
    y = jax.lax.conv_general_dilated(
        x.astype(jnp.bfloat16), w_hwio, (1, 1),
        [(k - 1 - pad, k - 1 - pad + out_pad)] * 2,
        lhs_dilation=(stride, stride),
        dimension_numbers=("NHWC", "HWIO", "NHWC"),
        preferred_element_type=jnp.float32)
    return y + b.reshape(1, 1, 1, -1)


def autoencoder_reference(params, x):
    """Independent XLA reference with the same bf16 operand rounding."""
    r = params["raw"]
    h = x.transpose(0, 2, 3, 1)
    h = jnp.maximum(_conv_ref(h, *r["enc1"], 2, 1), 0.0)
    h = jnp.maximum(_conv_ref(h, *r["enc2"], 2, 1), 0.0)
    h = _conv_ref(h, *r["enc3"], 1, 0)                           # no act (matches torch)
    h = jnp.maximum(_convT_ref(h, *r["dec1"], 1, 0, 0), 0.0)     # (B,7,7,32)
    h = jnp.maximum(_convT_ref(h, *r["dec2"], 2, 1, 1), 0.0)     # (B,14,14,16)
    h = jax.nn.sigmoid(_convT_ref(h, *r["dec3"], 2, 1, 1))       # (B,28,28,1)
    return h.transpose(0, 3, 1, 2)


if __name__ == "__main__":
    key = jax.random.PRNGKey(0)
    pkey, xkey = jax.random.split(key)
    params = init_params(pkey)
    # 28x28 input is required by the 7x7 valid conv after two stride-2 convs.
    x = jax.random.uniform(xkey, (2, 1, 28, 28), jnp.float32)

    fwd = jax.jit(autoencoder_forward)
    ref = jax.jit(autoencoder_reference)

    y = jax.block_until_ready(fwd(params, x))
    y_ref = jax.block_until_ready(ref(params, x))

    assert y.shape == (2, 1, 28, 28), y.shape
    assert y.dtype == jnp.float32, y.dtype
    max_err = float(jnp.max(jnp.abs(y - y_ref)))
    assert max_err < 1e-3, f"mismatch vs XLA reference: {max_err}"

    print("KERNEL_OK")
</pallas_src>

<mosaic_0001>
module attributes {stable_mosaic.version = 11 : i64} {
  func.func @_mm_bias_act_kernel(%arg0: i32, %arg1: memref<56x9xbf16, #tpu.memory_space<vmem>>, %arg2: memref<9x128xbf16, #tpu.memory_space<vmem>>, %arg3: memref<1x128xf32, #tpu.memory_space<vmem>>, %arg4: memref<56x16xbf16, #tpu.memory_space<vmem>>) attributes {dimension_semantics = [#tpu.dimension_semantics<parallel>], iteration_bounds = array<i64: 7>, scalar_prefetch = 0 : i64, scratch_operands = 0 : i64, tpu.core_type = #tpu.core_type<tc>, window_params = [{transform_indices = @transform_0, window_bounds = array<i64: 56, 9>}, {pipeline_mode = #tpu.pipeline_mode<synchronous>, transform_indices = @transform_1, window_bounds = array<i64: 9, 128>}, {pipeline_mode = #tpu.pipeline_mode<synchronous>, transform_indices = @transform_2, window_bounds = array<i64: 1, 128>}, {transform_indices = @transform_3, window_bounds = array<i64: 56, 16>}]} {
    %c0 = arith.constant 0 : index
    %c0_0 = arith.constant 0 : index
    %0 = vector.load %arg1[%c0, %c0_0] : memref<56x9xbf16, #tpu.memory_space<vmem>>, vector<56x9xbf16>
    %c0_1 = arith.constant 0 : index
    %c0_2 = arith.constant 0 : index
    %1 = vector.load %arg2[%c0_1, %c0_2] : memref<9x128xbf16, #tpu.memory_space<vmem>>, vector<9x128xbf16>
    %cst = arith.constant dense<0.000000e+00> : vector<56x128xf32>
    %2 = tpu.matmul %0, %1, %cst {dimension_numbers = #tpu.dot_dimension_numbers<[1], [0], [0], [1], [0, 0, 1, 1], [], []>} : vector<56x9xbf16>, vector<9x128xbf16>, vector<56x128xf32> -> vector<56x128xf32>
    %c0_3 = arith.constant 0 : index
    %c0_4 = arith.constant 0 : index
    %3 = vector.load %arg3[%c0_3, %c0_4] : memref<1x128xf32, #tpu.memory_space<vmem>>, vector<1x128xf32>
    %4 = vector.broadcast %3 : vector<1x128xf32> to vector<56x128xf32>
    %5 = arith.addf %2, %4 : vector<56x128xf32>
    %6 = vector.extract_strided_slice %5 {offsets = [0, 0], sizes = [56, 16], strides = [1, 1]} : vector<56x128xf32> to vector<56x16xf32>
    %cst_5 = arith.constant 0.000000e+00 : f32
    %7 = vector.broadcast %cst_5 : f32 to vector<56x16xf32>
    %8 = arith.maximumf %6, %7 : vector<56x16xf32>
    %9 = arith.truncf %8 : vector<56x16xf32> to vector<56x16xbf16>
    %c0_6 = arith.constant 0 : index
    %c0_7 = arith.constant 0 : index
    %10 = vector.load %arg4[%c0_6, %c0_7] : memref<56x16xbf16, #tpu.memory_space<vmem>>, vector<56x16xbf16>
    tpu.vector_store %arg4[%c0_6, %c0_7], %9 {strides = array<i32>} : memref<56x16xbf16, #tpu.memory_space<vmem>>, vector<56x16xbf16>,
    return
  }
  func.func @transform_0(%arg0: i32) -> (i32, i32) {
    %c0_i32 = arith.constant 0 : i32
    %c0_i32_0 = arith.constant 0 : i32
    return %arg0, %c0_i32 : i32, i32
  }
  func.func @transform_1(%arg0: i32) -> (i32, i32) {
    %c0_i32 = arith.constant 0 : i32
    %c0_i32_0 = arith.constant 0 : i32
    %c0_i32_1 = arith.constant 0 : i32
    return %c0_i32, %c0_i32_0 : i32, i32
  }
  func.func @transform_2(%arg0: i32) -> (i32, i32) {
    %c0_i32 = arith.constant 0 : i32
    %c0_i32_0 = arith.constant 0 : i32
    %c0_i32_1 = arith.constant 0 : i32
    return %c0_i32, %c0_i32_0 : i32, i32
  }
  func.func @transform_3(%arg0: i32) -> (i32, i32) {
    %c0_i32 = arith.constant 0 : i32
    %c0_i32_0 = arith.constant 0 : i32
    return %arg0, %c0_i32 : i32, i32
  }
}

module attributes {stable_mosaic.version = 11 : i64} {
  func.func @_mm_bias_act_kernel(%arg0: i32, %arg1: memref<98x144xbf16, #tpu.memory_space<vmem>>, %arg2: memref<144x128xbf16, #tpu.memory_space<vmem>>, %arg3: memref<1x128xf32, #tpu.memory_space<vmem>>, %arg4: memref<98x32xbf16, #tpu.memory_space<vmem>>) attributes {dimension_semantics = [#tpu.dimension_semantics<parallel>], iteration_bounds = array<i64: 1>, scalar_prefetch = 0 : i64, scratch_operands = 0 : i64, tpu.core_type = #tpu.core_type<tc>, window_params = [{transform_indices = @transform_0, window_bounds = array<i64: 98, 144>}, {pipeline_mode = #tpu.pipeline_mode<synchronous>, transform_indices = @transform_1, window_bounds = array<i64: 144, 128>}, {pipeline_mode = #tpu.pipeline_mode<synchronous>, transform_indices = @transform_2, window_bounds = array<i64: 1, 128>}, {transform_indices = @transform_3, window_bounds = array<i64: 98, 32>}]} {
    %c0 = arith.constant 0 : index
    %c0_0 = arith.constant 0 : index
    %0 = vector.load %arg1[%c0, %c0_0] : memref<98x144xbf16, #tpu.memory_space<vmem>>, vector<98x144xbf16>
    %c0_1 = arith.constant 0 : index
    %c0_2 = arith.constant 0 : index
    %1 = vector.load %arg2[%c0_1, %c0_2] : memref<144x128xbf16, #tpu.memory_space<vmem>>, vector<144x128xbf16>
    %cst = arith.constant dense<0.000000e+00> : vector<98x128xf32>
    %2 = tpu.matmul %0, %1, %cst {dimension_numbers = #tpu.dot_dimension_numbers<[1], [0], [0], [1], [0, 0, 1, 1], [], []>} : vector<98x144xbf16>, vector<144x128xbf16>, vector<98x128xf32> -> vector<98x128xf32>
    %c0_3 = arith.constant 0 : index
    %c0_4 = arith.constant 0 : index
    %3 = vector.load %arg3[%c0_3, %c0_4] : memref<1x128xf32, #tpu.memory_space<vmem>>, vector<1x128xf32>
    %4 = vector.broadcast %3 : vector<1x128xf32> to vector<98x128xf32>
    %5 = arith.addf %2, %4 : vector<98x128xf32>
    %6 = vector.extract_strided_slice %5 {offsets = [0, 0], sizes = [98, 32], strides = [1, 1]} : vector<98x128xf32> to vector<98x32xf32>
    %cst_5 = arith.constant 0.000000e+00 : f32
    %7 = vector.broadcast %cst_5 : f32 to vector<98x32xf32>
    %8 = arith.maximumf %6, %7 : vector<98x32xf32>
    %9 = arith.truncf %8 : vector<98x32xf32> to vector<98x32xbf16>
    %c0_6 = arith.constant 0 : index
    %c0_7 = arith.constant 0 : index
    %10 = vector.load %arg4[%c0_6, %c0_7] : memref<98x32xbf16, #tpu.memory_space<vmem>>, vector<98x32xbf16>
    tpu.vector_store %arg4[%c0_6, %c0_7], %9 {strides = array<i32>} : memref<98x32xbf16, #tpu.memory_space<vmem>>, vector<98x32xbf16>,
    return
  }
  func.func @transform_0(%arg0: i32) -> (i32, i32) {
    %c0_i32 = arith.constant 0 : i32
    %c0_i32_0 = arith.constant 0 : i32
    return %arg0, %c0_i32 : i32, i32
  }
  func.func @transform_1(%arg0: i32) -> (i32, i32) {
    %c0_i32 = arith.constant 0 : i32
    %c0_i32_0 = arith.constant 0 : i32
    %c0_i32_1 = arith.constant 0 : i32
    return %c0_i32, %c0_i32_0 : i32, i32
  }
  func.func @transform_2(%arg0: i32) -> (i32, i32) {
    %c0_i32 = arith.constant 0 : i32
    %c0_i32_0 = arith.constant 0 : i32
    %c0_i32_1 = arith.constant 0 : i32
    return %c0_i32, %c0_i32_0 : i32, i32
  }
  func.func @transform_3(%arg0: i32) -> (i32, i32) {
    %c0_i32 = arith.constant 0 : i32
    %c0_i32_0 = arith.constant 0 : i32
    return %arg0, %c0_i32 : i32, i32
  }
}

module attributes {stable_mosaic.version = 11 : i64} {
  func.func @_bottleneck_kernel(%arg0: i32, %arg1: memref<2x1568xbf16, #tpu.memory_space<vmem>>, %arg2: memref<1568x64xbf16, #tpu.memory_space<vmem>>, %arg3: memref<1x64xf32, #tpu.memory_space<vmem>>, %arg4: memref<64x1568xbf16, #tpu.memory_space<vmem>>, %arg5: memref<1x1568xf32, #tpu.memory_space<vmem>>, %arg6: memref<2x1568xbf16, #tpu.memory_space<vmem>>) attributes {dimension_semantics = [#tpu.dimension_semantics<parallel>], iteration_bounds = array<i64: 1>, scalar_prefetch = 0 : i64, scratch_operands = 0 : i64, tpu.core_type = #tpu.core_type<tc>, window_params = [{transform_indices = @transform_0, window_bounds = array<i64: 2, 1568>}, {pipeline_mode = #tpu.pipeline_mode<synchronous>, transform_indices = @transform_1, window_bounds = array<i64: 1568, 64>}, {pipeline_mode = #tpu.pipeline_mode<synchronous>, transform_indices = @transform_2, window_bounds = array<i64: 1, 64>}, {pipeline_mode = #tpu.pipeline_mode<synchronous>, transform_indices = @transform_3, window_bounds = array<i64: 64, 1568>}, {pipeline_mode = #tpu.pipeline_mode<synchronous>, transform_indices = @transform_4, window_bounds = array<i64: 1, 1568>}, {transform_indices = @transform_5, window_bounds = array<i64: 2, 1568>}]} {
    %c0 = arith.constant 0 : index
    %c0_0 = arith.constant 0 : index
    %0 = vector.load %arg1[%c0, %c0_0] : memref<2x1568xbf16, #tpu.memory_space<vmem>>, vector<2x1568xbf16>
    %c0_1 = arith.constant 0 : index
    %c0_2 = arith.constant 0 : index
    %1 = vector.load %arg2[%c0_1, %c0_2] : memref<1568x64xbf16, #tpu.memory_space<vmem>>, vector<1568x64xbf16>
    %cst = arith.constant dense<0.000000e+00> : vector<2x64xf32>
    %2 = tpu.matmul %0, %1, %cst {dimension_numbers = #tpu.dot_dimension_numbers<[1], [0], [0], [1], [0, 0, 1, 1], [], []>} : vector<2x1568xbf16>, vector<1568x64xbf16>, vector<2x64xf32> -> vector<2x64xf32>
    %c0_3 = arith.constant 0 : index
    %c0_4 = arith.constant 0 : index
    %3 = vector.load %arg3[%c0_3, %c0_4] : memref<1x64xf32, #tpu.memory_space<vmem>>, vector<1x64xf32>
    %4 = vector.broadcast %3 : vector<1x64xf32> to vector<2x64xf32>
    %5 = arith.addf %2, %4 : vector<2x64xf32>
    %6 = arith.truncf %5 : vector<2x64xf32> to vector<2x64xbf16>
    %c0_5 = arith.constant 0 : index
    %c0_6 = arith.constant 0 : index
    %7 = vector.load %arg4[%c0_5, %c0_6] : memref<64x1568xbf16, #tpu.memory_space<vmem>>, vector<64x1568xbf16>
    %cst_7 = arith.constant dense<0.000000e+00> : vector<2x1568xf32>
    %8 = tpu.matmul %6, %7, %cst_7 {dimension_numbers = #tpu.dot_dimension_numbers<[1], [0], [0], [1], [0, 0, 1, 1], [], []>} : vector<2x64xbf16>, vector<64x1568xbf16>, vector<2x1568xf32> -> vector<2x1568xf32>
    %c0_8 = arith.constant 0 : index
    %c0_9 = arith.constant 0 : index
    %9 = vector.load %arg5[%c0_8, %c0_9] : memref<1x1568xf32, #tpu.memory_space<vmem>>, vector<1x1568xf32>
    %10 = vector.broadcast %9 : vector<1x1568xf32> to vector<2x1568xf32>
    %11 = arith.addf %8, %10 : vector<2x1568xf32>
    %cst_10 = arith.constant 0.000000e+00 : f32
    %12 = vector.broadcast %cst_10 : f32 to vector<2x1568xf32>
    %13 = arith.maximumf %11, %12 : vector<2x1568xf32>
    %14 = arith.truncf %13 : vector<2x1568xf32> to vector<2x1568xbf16>
    %c0_11 = arith.constant 0 : index
    %c0_12 = arith.constant 0 : index
    %15 = vector.load %arg6[%c0_11, %c0_12] : memref<2x1568xbf16, #tpu.memory_space<vmem>>, vector<2x1568xbf16>
    tpu.vector_store %arg6[%c0_11, %c0_12], %14 {strides = array<i32>} : memref<2x1568xbf16, #tpu.memory_space<vmem>>, vector<2x1568xbf16>,
    return
  }
  func.func @transform_0(%arg0: i32) -> (i32, i32) {
    %c0_i32 = arith.constant 0 : i32
    %c0_i32_0 = arith.constant 0 : i32
    return %arg0, %c0_i32 : i32, i32
  }
  func.func @transform_1(%arg0: i32) -> (i32, i32) {
    %c0_i32 = arith.constant 0 : i32
    %c0_i32_0 = arith.constant 0 : i32
    %c0_i32_1 = arith.constant 0 : i32
    return %c0_i32, %c0_i32_0 : i32, i32
  }
  func.func @transform_2(%arg0: i32) -> (i32, i32) {
    %c0_i32 = arith.constant 0 : i32
    %c0_i32_0 = arith.constant 0 : i32
    %c0_i32_1 = arith.constant 0 : i32
    return %c0_i32, %c0_i32_0 : i32, i32
  }
  func.func @transform_3(%arg0: i32) -> (i32, i32) {
    %c0_i32 = arith.constant 0 : i32
    %c0_i32_0 = arith.constant 0 : i32
    %c0_i32_1 = arith.constant 0 : i32
    return %c0_i32, %c0_i32_0 : i32, i32
  }
  func.func @transform_4(%arg0: i32) -> (i32, i32) {
    %c0_i32 = arith.constant 0 : i32
    %c0_i32_0 = arith.constant 0 : i32
    %c0_i32_1 = arith.constant 0 : i32
    return %c0_i32, %c0_i32_0 : i32, i32
  }
  func.func @transform_5(%arg0: i32) -> (i32, i32) {
    %c0_i32 = arith.constant 0 : i32
    %c0_i32_0 = arith.constant 0 : i32
    return %arg0, %c0_i32 : i32, i32
  }
}

module attributes {stable_mosaic.version = 11 : i64} {
  func.func @_mm_bias_act_kernel(%arg0: i32, %arg1: memref<98x128xbf16, #tpu.memory_space<vmem>>, %arg2: memref<128x128xbf16, #tpu.memory_space<vmem>>, %arg3: memref<1x128xf32, #tpu.memory_space<vmem>>, %arg4: memref<98x64xbf16, #tpu.memory_space<vmem>>) attributes {dimension_semantics = [#tpu.dimension_semantics<parallel>], iteration_bounds = array<i64: 1>, scalar_prefetch = 0 : i64, scratch_operands = 0 : i64, tpu.core_type = #tpu.core_type<tc>, window_params = [{transform_indices = @transform_0, window_bounds = array<i64: 98, 128>}, {pipeline_mode = #tpu.pipeline_mode<synchronous>, transform_indices = @transform_1, window_bounds = array<i64: 128, 128>}, {pipeline_mode = #tpu.pipeline_mode<synchronous>, transform_indices = @transform_2, window_bounds = array<i64: 1, 128>}, {transform_indices = @transform_3, window_bounds = array<i64: 98, 64>}]} {
    %c0 = arith.constant 0 : index
    %c0_0 = arith.constant 0 : index
    %0 = vector.load %arg1[%c0, %c0_0] : memref<98x128xbf16, #tpu.memory_space<vmem>>, vector<98x128xbf16>
    %c0_1 = arith.constant 0 : index
    %c0_2 = arith.constant 0 : index
    %1 = vector.load %arg2[%c0_1, %c0_2] : memref<128x128xbf16, #tpu.memory_space<vmem>>, vector<128x128xbf16>
    %cst = arith.constant dense<0.000000e+00> : vector<98x128xf32>
    %2 = tpu.matmul %0, %1, %cst {dimension_numbers = #tpu.dot_dimension_numbers<[1], [0], [0], [1], [0, 0, 1, 1], [], []>} : vector<98x128xbf16>, vector<128x128xbf16>, vector<98x128xf32> -> vector<98x128xf32>
    %c0_3 = arith.constant 0 : index
    %c0_4 = arith.constant 0 : index
    %3 = vector.load %arg3[%c0_3, %c0_4] : memref<1x128xf32, #tpu.memory_space<vmem>>, vector<1x128xf32>
    %4 = vector.broadcast %3 : vector<1x128xf32> to vector<98x128xf32>
    %5 = arith.addf %2, %4 : vector<98x128xf32>
    %6 = vector.extract_strided_slice %5 {offsets = [0, 0], sizes = [98, 64], strides = [1, 1]} : vector<98x128xf32> to vector<98x64xf32>
    %cst_5 = arith.constant 0.000000e+00 : f32
    %7 = vector.broadcast %cst_5 : f32 to vector<98x64xf32>
    %8 = arith.maximumf %6, %7 : vector<98x64xf32>
    %9 = arith.truncf %8 : vector<98x64xf32> to vector<98x64xbf16>
    %c0_6 = arith.constant 0 : index
    %c0_7 = arith.constant 0 : index
    %10 = vector.load %arg4[%c0_6, %c0_7] : memref<98x64xbf16, #tpu.memory_space<vmem>>, vector<98x64xbf16>
    tpu.vector_store %arg4[%c0_6, %c0_7], %9 {strides = array<i32>} : memref<98x64xbf16, #tpu.memory_space<vmem>>, vector<98x64xbf16>,
    return
  }
  func.func @transform_0(%arg0: i32) -> (i32, i32) {
    %c0_i32 = arith.constant 0 : i32
    %c0_i32_0 = arith.constant 0 : i32
    return %arg0, %c0_i32 : i32, i32
  }
  func.func @transform_1(%arg0: i32) -> (i32, i32) {
    %c0_i32 = arith.constant 0 : i32
    %c0_i32_0 = arith.constant 0 : i32
    %c0_i32_1 = arith.constant 0 : i32
    return %c0_i32, %c0_i32_0 : i32, i32
  }
  func.func @transform_2(%arg0: i32) -> (i32, i32) {
    %c0_i32 = arith.constant 0 : i32
    %c0_i32_0 = arith.constant 0 : i32
    %c0_i32_1 = arith.constant 0 : i32
    return %c0_i32, %c0_i32_0 : i32, i32
  }
  func.func @transform_3(%arg0: i32) -> (i32, i32) {
    %c0_i32 = arith.constant 0 : i32
    %c0_i32_0 = arith.constant 0 : i32
    return %arg0, %c0_i32 : i32, i32
  }
}

module attributes {stable_mosaic.version = 11 : i64} {
  func.func @_mm_bias_act_kernel(%arg0: i32, %arg1: memref<56x64xbf16, #tpu.memory_space<vmem>>, %arg2: memref<64x128xbf16, #tpu.memory_space<vmem>>, %arg3: memref<1x128xf32, #tpu.memory_space<vmem>>, %arg4: memref<56x4xf32, #tpu.memory_space<vmem>>) attributes {dimension_semantics = [#tpu.dimension_semantics<parallel>], iteration_bounds = array<i64: 7>, scalar_prefetch = 0 : i64, scratch_operands = 0 : i64, tpu.core_type = #tpu.core_type<tc>, window_params = [{transform_indices = @transform_0, window_bounds = array<i64: 56, 64>}, {pipeline_mode = #tpu.pipeline_mode<synchronous>, transform_indices = @transform_1, window_bounds = array<i64: 64, 128>}, {pipeline_mode = #tpu.pipeline_mode<synchronous>, transform_indices = @transform_2, window_bounds = array<i64: 1, 128>}, {transform_indices = @transform_3, window_bounds = array<i64: 56, 4>}]} {
    %c0 = arith.constant 0 : index
    %c0_0 = arith.constant 0 : index
    %0 = vector.load %arg1[%c0, %c0_0] : memref<56x64xbf16, #tpu.memory_space<vmem>>, vector<56x64xbf16>
    %c0_1 = arith.constant 0 : index
    %c0_2 = arith.constant 0 : index
    %1 = vector.load %arg2[%c0_1, %c0_2] : memref<64x128xbf16, #tpu.memory_space<vmem>>, vector<64x128xbf16>
    %cst = arith.constant dense<0.000000e+00> : vector<56x128xf32>
    %2 = tpu.matmul %0, %1, %cst {dimension_numbers = #tpu.dot_dimension_numbers<[1], [0], [0], [1], [0, 0, 1, 1], [], []>} : vector<56x64xbf16>, vector<64x128xbf16>, vector<56x128xf32> -> vector<56x128xf32>
    %c0_3 = arith.constant 0 : index
    %c0_4 = arith.constant 0 : index
    %3 = vector.load %arg3[%c0_3, %c0_4] : memref<1x128xf32, #tpu.memory_space<vmem>>, vector<1x128xf32>
    %4 = vector.broadcast %3 : vector<1x128xf32> to vector<56x128xf32>
    %5 = arith.addf %2, %4 : vector<56x128xf32>
    %6 = vector.extract_strided_slice %5 {offsets = [0, 0], sizes = [56, 4], strides = [1, 1]} : vector<56x128xf32> to vector<56x4xf32>
    %7 = arith.negf %6 : vector<56x4xf32>
    %8 = math.exp %7 : vector<56x4xf32>
    %cst_5 = arith.constant 1.000000e+00 : f32
    %9 = vector.broadcast %cst_5 : f32 to vector<56x4xf32>
    %10 = arith.addf %9, %8 : vector<56x4xf32>
    %11 = arith.divf %9, %10 : vector<56x4xf32>
    %c0_6 = arith.constant 0 : index
    %c0_7 = arith.constant 0 : index
    %12 = vector.load %arg4[%c0_6, %c0_7] : memref<56x4xf32, #tpu.memory_space<vmem>>, vector<56x4xf32>
    tpu.vector_store %arg4[%c0_6, %c0_7], %11 {strides = array<i32>} : memref<56x4xf32, #tpu.memory_space<vmem>>, vector<56x4xf32>,
    return
  }
  func.func @transform_0(%arg0: i32) -> (i32, i32) {
    %c0_i32 = arith.constant 0 : i32
    %c0_i32_0 = arith.constant 0 : i32
    return %arg0, %c0_i32 : i32, i32
  }
  func.func @transform_1(%arg0: i32) -> (i32, i32) {
    %c0_i32 = arith.constant 0 : i32
    %c0_i32_0 = arith.constant 0 : i32
    %c0_i32_1 = arith.constant 0 : i32
    return %c0_i32, %c0_i32_0 : i32, i32
  }
  func.func @transform_2(%arg0: i32) -> (i32, i32) {
    %c0_i32 = arith.constant 0 : i32
    %c0_i32_0 = arith.constant 0 : i32
    %c0_i32_1 = arith.constant 0 : i32
    return %c0_i32, %c0_i32_0 : i32, i32
  }
  func.func @transform_3(%arg0: i32) -> (i32, i32) {
    %c0_i32 = arith.constant 0 : i32
    %c0_i32_0 = arith.constant 0 : i32
    return %arg0, %c0_i32 : i32, i32
  }
}

</mosaic_0001>

<bundles_post_ra>
// kernel: autoencoder_forward.5
= control target key start
LH: loop header
LB: loop body
LE: loop exit
PB: predicated region body
PF: predicated region fallthrough
CT: control target
= control target key end

     0   :  { %s491_s12 = smov 0   ;;  %s524_s0 = inlined_call_operand.vmem [shape: bf16[392,9], index: 0, kind: input, shape index: {}]   ;;  %s525_s1 = inlined_call_operand.vmem [shape: bf16[9,128], index: 1, kind: input, shape index: {}]   ;;  %s526_s2 = inlined_call_operand.vmem [shape: f32[1,128], index: 2, kind: input, shape index: {}]   ;;  %s527_s3 = inlined_call_operand.vmem [shape: bf16[392,16], index: 3, kind: output, shape index: {}]  }
   0x1 LB: > { %s398_s13 = sadd.s32 4294967295, %s468_s12   ;;  %p402_p0 = scmp.ge.s32.totalorder %s468_s12, 1  ;;  %s468_s12 = sphi %s491_s12, %s13_s12  }
   0x2   : > { %p138_p1 = scmp.lt.s32.totalorder %s468_s12, 8 }
   0x4   : > { %p139_p2 = pnand %p402_p0, %p138_p1 }
   0x5   : > { %v457_v0 = vld [vmem:[%s525_s1] sm:$0x1f] (!%p139_p2)   ;;  %vm227_vm0 = vcmask (!%p139_p2), 1043456   ;;  %vm228_vm1 = vcmask (!%p139_p2), 1044480   ;;  %s162_s16 = smul.u32 (!%p139_p2), 7, %s398_s13  ;;  %v470_v1 = vmov (!%p139_p2), 65535  }
   0x6   : > { %142 = sbr.rel (%p139_p2) target bundleno = 240 (0xf0), region = 32  ;;  %v229_v2 = vsel (!%p139_p2), %vm227_vm0, 4294967295, %v470_v1  ;;  %vm214_vm2 = vcmask (!%p139_p2), 72704   ;;  %v405_v9 = vld [vmem:[%s526_s2] ss:$0 sm:$0xff] (!%p139_p2)  ;;  %vm334_vm3 = vcmask (!%p139_p2), 125952  }
   0x7   : > { %v230_v3 = vsel (!%p139_p2), %vm228_vm1, %v229_v2, 0  ;;  %p163_p3 = scmp.lt.s32.totalorder (!%p139_p2), %s162_s16, 48 }
   0x8   : > { %v232_v4 = vand.u32 (!%p139_p2), %v457_v0, %v230_v3 }
   0xa   : > { %436 = vmatprep.subr.bf16.mxu0 (!%p139_p2), %v232_v4  ;;  %446 = vmatprep.subr.bf16.mxu1 (!%p139_p2), %v232_v4 }
   0xb   : > { %437 = vmatpush3.bf16.msra.mxu0 (!%p139_p2), %v232_v4  ;;  %447 = vmatpush3.bf16.msra.mxu1 (!%p139_p2), %v232_v4 }
   0xd   : > { %s529_s16 = smov (!%p163_p3, %s162_s16), 48 }
   0xe   : > { %s403_s17 = sshll.u32 %s529_s16, 2 }
   0xf   : > { %s166_s20 = scalar_lea.vmem %s524_s0, %s403_s17  ;;  %s172_s25 = scalar_lea.vmem %s527_s3, %s403_s17 }
  0x10   : > { %v458_v5 = vld [vmem:[%s166_s20] sm:$0xff]   ;;  %v459_v6 = vld [vmem:[%s166_s20 + $0x10] sm:$0xff]   ;;  %v460_v7 = vld [vmem:[%s166_s20 + $0x8] sm:$0xff]  }
  0x11   : > { %438 = vmatprep.mubr.msk.bf16.mxu0 %vm214_vm2, %v458_v5  ;;  %442 = vmatprep.mubr.msk.bf16.mxu1 %vm214_vm2, %v459_v6  ;;  %v461_v8 = vld [vmem:[%s166_s20 + $0x18] ss:$0 sps:$4 sm:$0xff]  }
  0x12   : > { %439 = vmatmul.mubr.msk.bf16.vlgmr.msra.gmra.mrb[0].mxu0 %vm214_vm2, %v460_v7  ;;  %443 = vmatmul.mubr.msk.bf16.vlgmr.msra.gmra.mrb[0].mxu1 %vm214_vm2, %v461_v8 }
  0xe5   : > { %v440_v10 = vpop.f32.mrb[0].mxu0  ;;  %v444_v12 = vpop.f32.mrb[0].mxu1 }
  0xe6   : > { %v277_v11 = vadd.f32 %v440_v10, %v405_v9  ;;  %v268_v13 = vpop.f32.mrb[1].mxu0  ;;  %v293_v14 = vadd.f32 %v444_v12, %v405_v9  ;;  %v284_v16 = vpop.f32.mrb[1].mxu1 }
  0xe7   : > { %v269_v15 = vadd.f32 %v405_v9, %v268_v13  ;;  %v441_v17 = vpop.f32.mrb[2].mxu0  ;;  %v285_v19 = vadd.f32 %v405_v9, %v284_v16  ;;  %v445_v21 = vpop.f32.mrb[2].mxu1 }
  0xe8   : > { %v300_v18 = vmax.f32 %v277_v11, 0.0  ;;  %v280_v20 = vadd.f32 %v441_v17, %v405_v9  ;;  %v271_v22 = vpop.f32.mrb[3].mxu0  ;;  %v304_v23 = vmax.f32 %v293_v14, 0.0  ;;  %v287_v26 = vpop.f32.mrb[3].mxu1 }
  0xe9   : > { %v298_v24 = vmax.f32 %v269_v15, 0.0  ;;  %v272_v25 = vadd.f32 %v405_v9, %v271_v22  ;;  %v302_v28 = vmax.f32 %v285_v19, 0.0  ;;  %v288_v30 = vadd.f32 %v405_v9, %v287_v26 }
  0xea   : > { %v426_v27 = vpack.c.bf16 %v300_v18, %v300_v18  ;;  %v301_v29 = vmax.f32 %v280_v20, 0.0  ;;  %v430_v31 = vpack.c.bf16 %v304_v23, %v304_v23 }
  0xeb   : > { %v424_v32 = vpack.c.bf16 %v298_v24, %v298_v24  ;;  %v299_v33 = vmax.f32 %v272_v25, 0.0  ;;  %v428_v34 = vpack.c.bf16 %v302_v28, %v302_v28  ;;  %v303_v36 = vmax.f32 %v288_v30, 0.0 }
  0xec   : > { %337 = vst.msk [vmem:[%s172_s25 + $0x8] sm:$0xf] %vm334_vm3, %v426_v27  ;;  %v427_v35 = vpack.c.bf16 %v301_v29, %v301_v29  ;;  %341 = vst.msk [vmem:[%s172_s25 + $0x18] sm:$0xf] %vm334_vm3, %v430_v31 }
  0xed   : > { %335 = vst.msk [vmem:[%s172_s25] sm:$0xf] %vm334_vm3, %v424_v32  ;;  %v425_v37 = vpack.c.bf16 %v299_v33, %v299_v33  ;;  %339 = vst.msk [vmem:[%s172_s25 + $0x10] sm:$0xf] %vm334_vm3, %v428_v34  ;;  %v429_v38 = vpack.c.bf16 %v303_v36, %v303_v36 }
  0xee   : > { %338 = vst.msk [vmem:[%s172_s25 + $0xc] sm:$0xf] %vm334_vm3, %v427_v35 }
  0xef   : > { %336 = vst.msk [vmem:[%s172_s25 + $0x4] sm:$0xf] %vm334_vm3, %v425_v37  ;;  %340 = vst.msk [vmem:[%s172_s25 + $0x14] sm:$0xf] %vm334_vm3, %v429_v38 }
  0xf0 PF: > { %s13_s12 = sadd.s32 1, %s468_s12  }
  0xf1   : > { %p10_p4 = scmp.ge.s32.totalorder %s13_s12, 9  }
  0xf3   :  { %12 = sbr.rel (!%p10_p4) target bundleno = 1 (0x1), region = 62 }

// kernel: autoencoder_forward.6
= control target key start
LH: loop header
LB: loop body
LE: loop exit
PB: predicated region body
PF: predicated region fallthrough
CT: control target
= control target key end

     0   :  { %v467_v0 = vmov 0   ;;  %vm167_vm0 = vcmask 130048   ;;  %vm343_vm1 = vcmask 257024   ;;  %vm356_vm2 = vcmask 253952   ;;  %s630_s1 = inlined_call_operand.vmem [shape: bf16[144,128], index: 1, kind: input, shape index: {}]   ;;  %s631_s0 = inlined_call_operand.vmem [shape: bf16[98,144], index: 0, kind: input, shape index: {}]   ;;  %s632_s2 = inlined_call_operand.vmem [shape: f32[1,128], index: 2, kind: input, shape index: {}]   ;;  %s633_s3 = inlined_call_operand.vmem [shape: bf16[98,32], index: 3, kind: output, shape index: {}]  }
   0x1   :  { %189 = vmatprep.subr.bf16.mxu0 %v467_v0  ;;  %v438_v1 = vld [vmem:[%s630_s1] sm:$0xff]   ;;  %419 = vmatprep.subr.bf16.mxu1 %v467_v0  ;;  %v439_v2 = vld [vmem:[%s630_s1 + $0x8] sm:$0xff]   ;;  %v440_v3 = vld [vmem:[%s630_s1 + $0x10] sm:$0xff]  }
   0x2   :  { %190 = vmatpush1.bf16.msra.mxu0 %v438_v1  ;;  %428 = vmatpush1.bf16.msra.mxu1 %v438_v1  ;;  %v441_v4 = vld [vmem:[%s630_s1 + $0x18] sm:$0xff]   ;;  %v449_v5 = vld [vmem:[%s631_s0 + $0x4] ss:$8 sps:$4 sm:$0xff]   ;;  %v444_v9 = vld [vmem:[%s630_s1 + $0x30] sm:$0xff]  }
   0x3   :  { %191 = vmatprep.subr.bf16.mxu0 %v467_v0  ;;  %420 = vmatprep.subr.bf16.mxu1 %v467_v0  ;;  %v452_v6 = vld [vmem:[%s631_s0 + $0x44] ss:$8 sps:$4 sm:$0xff]   ;;  %v445_v10 = vld [vmem:[%s630_s1 + $0x38] sm:$0xff]   ;;  %v447_v12 = vld [vmem:[%s631_s0] ss:$8 sps:$4 sm:$0xff]  }
   0x4   :  { %386 = vmatprep.mubr.msk.bf16.mxu0 %vm167_vm0, %v449_v5  ;;  %390 = vmatprep.mubr.msk.bf16.mxu1 %vm167_vm0, %v452_v6  ;;  %v442_v7 = vld [vmem:[%s630_s1 + $0x20] sm:$0xff]   ;;  %v443_v8 = vld [vmem:[%s630_s1 + $0x28] sm:$0xff]   ;;  %v453_v14 = vld [vmem:[%s631_s0 + $0x14] ss:$8 sps:$4 sm:$0xff]  }
   0x5   :  { %v446_v11 = vld [vmem:[%s630_s1 + $0x40] sm:$0xff]   ;;  %v456_v15 = vld [vmem:[%s631_s0 + $0x54] ss:$8 sps:$4 sm:$0xff]   ;;  %v455_v17 = vld [vmem:[%s631_s0 + $0x10] ss:$8 sps:$4 sm:$0xff]  }
   0x6   :  { %192 = vmatpush1.bf16.msra.mxu0 %v439_v2  ;;  %429 = vmatpush1.bf16.msra.mxu1 %v439_v2  ;;  %v450_v13 = vld [vmem:[%s631_s0 + $0x40] ss:$8 sps:$4 sm:$0xff]   ;;  %v460_v18 = vld [vmem:[%s631_s0 + $0x50] ss:$8 sps:$4 sm:$0xff]   ;;  %v458_v19 = vld [vmem:[%s631_s0 + $0x24] ss:$8 sps:$4 sm:$0xff]  }
   0x7   :  { %193 = vmatprep.subr.bf16.mxu0 %v467_v0  ;;  %421 = vmatprep.subr.bf16.mxu1 %v467_v0  ;;  %v27_v16 = vld [vmem:[%s631_s0 + $0x60] sm:$0x11]  ;;  %v463_v23 = vld [vmem:[%s631_s0 + $0x34] ss:$8 sps:$4 sm:$0xff]   ;;  %v466_v24 = vld [vmem:[%s631_s0 + $0x30] ss:$8 sps:$4 sm:$0xff]  }
   0x8   :  { %v376_v20 = vcombine.high %v27_v16, %v27_v16  ;;  %v461_v21 = vld [vmem:[%s631_s0 + $0x20] ss:$8 sps:$4 sm:$0xff]   ;;  %v375_v22 = vcombine.low %v27_v16, %v27_v16 }
   0x9   :  { %v564_v25 = vld [vmem:[%s632_s2] ss:$0 sm:$0xff] }
   0xa   :  { %194 = vmatpush1.bf16.msra.mxu0 %v440_v3  ;;  %430 = vmatpush1.bf16.msra.mxu1 %v440_v3 }
   0xb   :  { %195 = vmatprep.subr.bf16.mxu0 %v467_v0  ;;  %422 = vmatprep.subr.bf16.mxu1 %v467_v0 }
   0xe   :  { %196 = vmatpush1.bf16.msra.mxu0 %v441_v4  ;;  %431 = vmatpush1.bf16.msra.mxu1 %v441_v4 }
   0xf   :  { %197 = vmatprep.subr.bf16.mxu0 %v467_v0  ;;  %423 = vmatprep.subr.bf16.mxu1 %v467_v0 }
  0x12   :  { %198 = vmatpush1.bf16.msra.mxu0 %v442_v7  ;;  %432 = vmatpush1.bf16.msra.mxu1 %v442_v7 }
  0x13   :  { %199 = vmatprep.subr.bf16.mxu0 %v467_v0  ;;  %424 = vmatprep.subr.bf16.mxu1 %v467_v0 }
  0x16   :  { %200 = vmatpush1.bf16.msra.mxu0 %v443_v8  ;;  %433 = vmatpush1.bf16.msra.mxu1 %v443_v8 }
  0x17   :  { %201 = vmatprep.subr.bf16.mxu0 %v467_v0  ;;  %425 = vmatprep.subr.bf16.mxu1 %v467_v0 }
  0x1a   :  { %202 = vmatpush1.bf16.msra.mxu0 %v444_v9  ;;  %434 = vmatpush1.bf16.msra.mxu1 %v444_v9 }
  0x1b   :  { %203 = vmatprep.subr.bf16.mxu0 %v467_v0  ;;  %426 = vmatprep.subr.bf16.mxu1 %v467_v0 }
  0x1e   :  { %204 = vmatpush1.bf16.msra.mxu0 %v445_v10  ;;  %435 = vmatpush1.bf16.msra.mxu1 %v445_v10 }
  0x1f   :  { %205 = vmatprep.subr.bf16.mxu0 %v467_v0  ;;  %427 = vmatprep.subr.bf16.mxu1 %v467_v0 }
  0x22   :  { %206 = vmatpush1.bf16.msra.mxu0 %v446_v11  ;;  %436 = vmatpush1.bf16.msra.mxu1 %v446_v11 }
  0x25   :  { %222 = vmatmul.mubr.bf16.vlgmr.msra.gmra.mrb[0].mxu0 %v447_v12  ;;  %254 = vmatmul.mubr.bf16.vlgmr.msra.gmra.mrb[0].mxu1 %v450_v13 }
  0x26   :  { %387 = vmatprep.mubr.msk.bf16.mxu0 %vm167_vm0, %v453_v14  ;;  %391 = vmatprep.mubr.msk.bf16.mxu1 %vm167_vm0, %v456_v15 }
  0x2d   :  { %230 = vmatmul.mubr.bf16.gmra.mrb[4].mxu0 %v455_v17  ;;  %262 = vmatmul.mubr.bf16.gmra.mrb[4].mxu1 %v460_v18 }
  0x2e   :  { %388 = vmatprep.mubr.msk.bf16.mxu0 %vm167_vm0, %v458_v19  ;;  %392 = vmatprep.mubr.msk.bf16.mxu1 %vm167_vm0, %v376_v20 }
  0x35   :  { %238 = vmatmul.mubr.bf16.gmra.mrb[8].mxu0 %v461_v21  ;;  %270 = vmatmul.mubr.bf16.gmra.mrb[8].mxu1 %v375_v22 }
  0x36   :  { %389 = vmatprep.mubr.msk.bf16.mxu0 %vm167_vm0, %v463_v23 }
  0x3d   :  { %246 = vmatmul.mubr.bf16.gmra.mrb[12].mxu0 %v466_v24 }
  0xf8   :  { %v223_v26 = vpop.f32.mrb[0].mxu0  ;;  %v255_v27 = vpop.f32.mrb[0].mxu1 }
  0xf9   :  { %v224_v28 = vadd.f32 %v564_v25, %v223_v26  ;;  %v225_v29 = vpop.f32.mrb[1].mxu0  ;;  %v256_v30 = vadd.f32 %v564_v25, %v255_v27  ;;  %v257_v31 = vpop.f32.mrb[1].mxu1 }
  0xfa   :  { %v226_v32 = vpop.f32.mrb[2].mxu0  ;;  %v258_v33 = vpop.f32.mrb[2].mxu1 }
  0xfb   :  { %v277_v34 = vmax.f32 %v224_v28, 0.0  ;;  %v227_v35 = vadd.f32 %v564_v25, %v226_v32  ;;  %v228_v36 = vpop.f32.mrb[3].mxu0  ;;  %v285_v37 = vmax.f32 %v256_v30, 0.0  ;;  %v259_v38 = vadd.f32 %v564_v25, %v258_v33  ;;  %v260_v39 = vpop.f32.mrb[3].mxu1 }
  0xfd   :  { %v406_v40 = vpack.c.bf16 %v277_v34, %v277_v34  ;;  %v278_v41 = vmax.f32 %v227_v35, 0.0  ;;  %v414_v42 = vpack.c.bf16 %v285_v37, %v285_v37  ;;  %v286_v43 = vmax.f32 %v259_v38, 0.0 }
  0xff   :  { %344 = vst.msk [vmem:[%s633_s3] sm:$0xf] %vm343_vm1, %v406_v40  ;;  %v407_v44 = vpack.c.bf16 %v278_v41, %v278_v41  ;;  %352 = vst.msk [vmem:[%s633_s3 + $0x20] sm:$0xf] %vm343_vm1, %v414_v42  ;;  %v415_v45 = vpack.c.bf16 %v286_v43, %v286_v43 }
 0x100   :  { %v231_v46 = vpop.f32.mrb[4].mxu0  ;;  %v263_v47 = vpop.f32.mrb[4].mxu1 }
 0x101   :  { %345 = vst.msk [vmem:[%s633_s3 + $0x4] sm:$0xf] %vm343_vm1, %v407_v44  ;;  %v232_v48 = vadd.f32 %v564_v25, %v231_v46  ;;  %v233_v49 = vpop.f32.mrb[5].mxu0  ;;  %353 = vst.msk [vmem:[%s633_s3 + $0x24] sm:$0xf] %vm343_vm1, %v415_v45  ;;  %v264_v50 = vadd.f32 %v564_v25, %v263_v47  ;;  %v265_v51 = vpop.f32.mrb[5].mxu1 }
 0x102   :  { %v234_v52 = vpop.f32.mrb[6].mxu0  ;;  %v266_v53 = vpop.f32.mrb[6].mxu1 }
 0x103   :  { %v279_v54 = vmax.f32 %v232_v48, 0.0  ;;  %v235_v55 = vadd.f32 %v564_v25, %v234_v52  ;;  %v236_v56 = vpop.f32.mrb[7].mxu0  ;;  %v287_v57 = vmax.f32 %v264_v50, 0.0  ;;  %v267_v58 = vadd.f32 %v564_v25, %v266_v53  ;;  %v268_v59 = vpop.f32.mrb[7].mxu1 }
 0x105   :  { %v408_v60 = vpack.c.bf16 %v279_v54, %v279_v54  ;;  %v280_v61 = vmax.f32 %v235_v55, 0.0  ;;  %v416_v62 = vpack.c.bf16 %v287_v57, %v287_v57  ;;  %v288_v63 = vmax.f32 %v267_v58, 0.0 }
 0x107   :  { %346 = vst.msk [vmem:[%s633_s3 + $0x8] sm:$0xf] %vm343_vm1, %v408_v60  ;;  %v409_v0 = vpack.c.bf16 %v280_v61, %v280_v61  ;;  %354 = vst.msk [vmem:[%s633_s3 + $0x28] sm:$0xf] %vm343_vm1, %v416_v62  ;;  %v417_v1 = vpack.c.bf16 %v288_v63, %v288_v63 }
 0x108   :  { %v239_v2 = vpop.f32.mrb[8].mxu0  ;;  %v271_v3 = vpop.f32.mrb[8].mxu1 }
 0x109   :  { %347 = vst.msk [vmem:[%s633_s3 + $0xc] sm:$0xf] %vm343_vm1, %v409_v0  ;;  %v240_v4 = vadd.f32 %v564_v25, %v239_v2  ;;  %v241_v5 = vpop.f32.mrb[9].mxu0  ;;  %355 = vst.msk [vmem:[%s633_s3 + $0x2c] sm:$0xf] %vm343_vm1, %v417_v1  ;;  %v272_v6 = vadd.f32 %v564_v25, %v271_v3  ;;  %v273_v7 = vpop.f32.mrb[9].mxu1 }
 0x10a   :  { %v242_v8 = vpop.f32.mrb[10].mxu0  ;;  %v274_v9 = vpop.f32.mrb[10].mxu1 }
 0x10b   :  { %v281_v10 = vmax.f32 %v240_v4, 0.0  ;;  %v243_v11 = vadd.f32 %v564_v25, %v242_v8  ;;  %v244_v12 = vpop.f32.mrb[11].mxu0  ;;  %v289_v13 = vmax.f32 %v272_v6, 0.0  ;;  %v275_v14 = vpop.f32.mrb[11].mxu1 }
 0x10d   :  { %v410_v15 = vpack.c.bf16 %v281_v10, %v281_v10  ;;  %v282_v16 = vmax.f32 %v243_v11, 0.0  ;;  %v418_v17 = vpack.c.bf16 %v289_v13, %v289_v13 }
 0x10f   :  { %348 = vst.msk [vmem:[%s633_s3 + $0x10] sm:$0xf] %vm343_vm1, %v410_v15  ;;  %v411_v18 = vpack.c.bf16 %v282_v16, %v282_v16 }
 0x110   :  { %357 = vst.msk [vmem:[%s633_s3 + $0x30] sm:$0x1] %vm356_vm2, %v418_v17  ;;  %v247_v19 = vpop.f32.mrb[12].mxu0 }
 0x111   :  { %349 = vst.msk [vmem:[%s633_s3 + $0x14] sm:$0xf] %vm343_vm1, %v411_v18  ;;  %v248_v20 = vadd.f32 %v564_v25, %v247_v19  ;;  %v249_v21 = vpop.f32.mrb[13].mxu0 }
 0x112   :  { %v250_v22 = vpop.f32.mrb[14].mxu0 }
 0x113   :  { %v283_v23 = vmax.f32 %v248_v20, 0.0  ;;  %v251_v24 = vadd.f32 %v564_v25, %v250_v22  ;;  %v252_v26 = vpop.f32.mrb[15].mxu0 }
 0x115   :  { %v412_v27 = vpack.c.bf16 %v283_v23, %v283_v23  ;;  %v284_v28 = vmax.f32 %v251_v24, 0.0 }
 0x117   :  { %350 = vst.msk [vmem:[%s633_s3 + $0x18] sm:$0xf] %vm343_vm1, %v412_v27  ;;  %v413_v29 = vpack.c.bf16 %v284_v28, %v284_v28 }
 0x119   :  { %351 = vst.msk [vmem:[%s633_s3 + $0x1c] sm:$0xf] %vm343_vm1, %v413_v29 }

// kernel: autoencoder_forward.7
= control target key start
LH: loop header
LB: loop body
LE: loop exit
PB: predicated region body
PF: predicated region fallthrough
CT: control target
= control target key end

     0   :  { %v2529_v22 = vmov 1966171168   ;;  %v232_v24 = vlaneseq  ;;  %vm2531_vm0 = vmmov 0   ;;  %vm916_vm1 = vcmask 261120   ;;  %s3132_s1 = inlined_call_operand.vmem [shape: bf16[1568,64], index: 1, kind: input, shape index: {}]   ;;  %s3133_s0 = inlined_call_operand.vmem [shape: bf16[2,1568], index: 0, kind: input, shape index: {}]   ;;  %s3134_s3 = inlined_call_operand.vmem [shape: bf16[64,1568], index: 3, kind: input, shape index: {}]   ;;  %s3135_s2 = inlined_call_operand.vmem [shape: f32[1,64], index: 2, kind: input, shape index: {}]   ;;  %s3136_s4 = inlined_call_operand.vmem [shape: f32[1,1568], index: 4, kind: input, shape index: {}]   ;;  %s3137_s5 = inlined_call_operand.vmem [shape: bf16[2,1568], index: 5, kind: output, shape index: {}]  }
   0x1   :  { %v2353_v0 = vld [vmem:[%s3132_s1 + $0x40] sm:$0xff]   ;;  %v2357_v4 = vld [vmem:[%s3132_s1 + $0x48] sm:$0xff]   ;;  %v2361_v8 = vld [vmem:[%s3132_s1 + $0x50] sm:$0xff]   ;;  %v230_v23 = vunpack.c.l.s4 %v2529_v22  ;;  %vm1590_vm2 = vcmask 523264   ;;  %vm2010_vm3 = vcmask 1040384   ;;  %vm2011_vm4 = vcmask 1041409  }
   0x2   :  { %v2354_v1 = vld [vmem:[%s3132_s1] sm:$0xff]   ;;  %2189 = vmatprep.subr.bf16.mxu0 %v2353_v0  ;;  %v2358_v5 = vld [vmem:[%s3132_s1 + $0x8] sm:$0xff]   ;;  %v2362_v9 = vld [vmem:[%s3132_s1 + $0x10] sm:$0xff]   ;;  %v2641_v30 = vshrl.u32 %v232_v24, 7  ;;  %vm2013_vm6 = vcmask 1042434   ;;  %vm2015_vm8 = vcmask 1043459  }
   0x3   :  { %v2355_v2 = vld [vmem:[%s3132_s1 + $0xc0] sm:$0xff]   ;;  %2190 = vmatpush3.bf16.msra.mxu0 %v2354_v1  ;;  %v2359_v6 = vld [vmem:[%s3132_s1 + $0xc8] sm:$0xff]   ;;  %v2363_v10 = vld [vmem:[%s3132_s1 + $0xd0] sm:$0xff]   ;;  %v231_v29 = vunpack.c.0.s8 %v230_v23  ;;  %vm2017_vm10 = vcmask 258052  }
   0x4   :  { %v2356_v3 = vld [vmem:[%s3132_s1 + $0x80] sm:$0xff]   ;;  %2211 = vmatprep.subr.bf16.mxu1 %v2355_v2  ;;  %2191 = vmatprep.subr.bf16.mxu0 %v2357_v4  ;;  %v2360_v7 = vld [vmem:[%s3132_s1 + $0x88] sm:$0xff]   ;;  %v2364_v11 = vld [vmem:[%s3132_s1 + $0x90] sm:$0xff]  }
   0x5   :  { %2212 = vmatpush3.bf16.msra.mxu1 %v2356_v3  ;;  %v2365_v12 = vld [vmem:[%s3132_s1 + $0x58] sm:$0xff]   ;;  %v2369_v16 = vld [vmem:[%s3132_s1 + $0x60] sm:$0xff]   ;;  %v2373_v20 = vld [vmem:[%s3132_s1 + $0x68] sm:$0xff]   ;;  %v2656_v35 = vsub.s32 %v231_v29, %v2641_v30 }
   0x6   :  { %2213 = vmatprep.subr.bf16.mxu1 %v2359_v6  ;;  %v2366_v13 = vld [vmem:[%s3132_s1 + $0x18] sm:$0xff]   ;;  %v2370_v17 = vld [vmem:[%s3132_s1 + $0x20] sm:$0xff]   ;;  %v2374_v21 = vld [vmem:[%s3132_s1 + $0x28] sm:$0xff]  }
   0x7   :  { %2192 = vmatpush3.bf16.msra.mxu0 %v2358_v5  ;;  %v2367_v14 = vld [vmem:[%s3132_s1 + $0xd8] sm:$0xff]   ;;  %v2371_v18 = vld [vmem:[%s3132_s1 + $0xe0] sm:$0xff]   ;;  %v2375_v25 = vld [vmem:[%s3132_s1 + $0xe8] sm:$0xff]  }
   0x8   :  { %2193 = vmatprep.subr.bf16.mxu0 %v2361_v8  ;;  %v2368_v15 = vld [vmem:[%s3132_s1 + $0x98] sm:$0xff]   ;;  %v2372_v19 = vld [vmem:[%s3132_s1 + $0xa0] sm:$0xff]   ;;  %v2376_v26 = vld [vmem:[%s3132_s1 + $0xa8] sm:$0xff]  }
   0x9   :  { %2214 = vmatpush3.bf16.msra.mxu1 %v2360_v7  ;;  %v2377_v27 = vld [vmem:[%s3132_s1 + $0x70] sm:$0xff]   ;;  %v2381_v33 = vld [vmem:[%s3132_s1 + $0x78] sm:$0xff]   ;;  %v21_v38 = vld [vmem:[%s3133_s0] sm:$0xff] }
   0xa   :  { %2215 = vmatprep.subr.bf16.mxu1 %v2363_v10  ;;  %v2378_v28 = vld [vmem:[%s3132_s1 + $0x30] sm:$0xff]   ;;  %v2382_v34 = vld [vmem:[%s3132_s1 + $0x38] sm:$0xff]   ;;  %v228_v39 = vcombine.high %v21_v38, %v21_v38  ;;  %v235_v40 = vrot.slane %v21_v38, %v2656_v35  ;;  %v2387_v41 = vld [vmem:[%s3132_s1 + $0x140] sm:$0xff]  }
   0xb   :  { %2194 = vmatpush3.bf16.msra.mxu0 %v2362_v9  ;;  %v2379_v31 = vld [vmem:[%s3132_s1 + $0xf0] sm:$0xff]   ;;  %v2383_v36 = vld [vmem:[%s3132_s1 + $0xf8] sm:$0xff]   ;;  %v2389_v44 = vld [vmem:[%s3132_s1 + $0x1c0] sm:$0xff]  }
   0xc   :  { %2195 = vmatprep.subr.bf16.mxu0 %v2365_v12  ;;  %v2380_v32 = vld [vmem:[%s3132_s1 + $0xb0] sm:$0xff]   ;;  %v2384_v37 = vld [vmem:[%s3132_s1 + $0xb8] sm:$0xff]   ;;  %v243_v42 = vcombine.high %v235_v40, %v235_v40  ;;  %v251_v43 = vrot.slane %v235_v40, %v2656_v35  ;;  %v2676_v45 = vrot.slane %v228_v39, %v2656_v35  ;;  %v2388_v47 = vld [vmem:[%s3132_s1 + $0x100] sm:$0xff]  }
   0xd   :  { %2216 = vmatpush3.bf16.msra.mxu1 %v2364_v11  ;;  %v2391_v50 = vld [vmem:[%s3132_s1 + $0x148] sm:$0xff]   ;;  %v2390_v52 = vld [vmem:[%s3132_s1 + $0x180] sm:$0xff]   ;;  %v2395_v57 = vld [vmem:[%s3132_s1 + $0x150] sm:$0xff]  }
   0xe   :  { %2217 = vmatprep.subr.bf16.mxu1 %v2367_v14  ;;  %v265_v46 = vrot.slane %v243_v42, %v2656_v35  ;;  %v244_v48 = vcombine.high %v2676_v45, %v2676_v45  ;;  %v273_v49 = vcombine.high %v251_v43, %v251_v43  ;;  %v2393_v54 = vld [vmem:[%s3132_s1 + $0x1c8] sm:$0xff]   ;;  %v2397_v59 = vld [vmem:[%s3132_s1 + $0x1d0] sm:$0xff]   ;;  %v2399_v61 = vld [vmem:[%s3132_s1 + $0x158] sm:$0xff]  }
   0xf   :  { %2196 = vmatpush3.bf16.msra.mxu0 %v2366_v13  ;;  %v2392_v55 = vld [vmem:[%s3132_s1 + $0x108] sm:$0xff]   ;;  %v2396_v60 = vld [vmem:[%s3132_s1 + $0x110] sm:$0xff]   ;;  %v2401_v63 = vld [vmem:[%s3132_s1 + $0x1d8] sm:$0xff]  }
  0x10   :  { %2197 = vmatprep.subr.bf16.mxu0 %v2369_v16  ;;  %952 = vmatprep.mubr.bf16.mxu0 %v265_v46  ;;  %v275_v51 = vcombine.high %v265_v46, %v265_v46  ;;  %v272_v53 = vrot.slane %v244_v48, %v2656_v35  ;;  %v2394_v58 = vld [vmem:[%s3132_s1 + $0x188] sm:$0xff]   ;;  %v2398_v62 = vld [vmem:[%s3132_s1 + $0x190] sm:$0xff]   ;;  %v2400_v0 = vld [vmem:[%s3132_s1 + $0x118] sm:$0xff]  }
  0x11   :  { %2218 = vmatpush3.bf16.msra.mxu1 %v2368_v15  ;;  %v2403_v1 = vld [vmem:[%s3132_s1 + $0x160] sm:$0xff]   ;;  %v2402_v2 = vld [vmem:[%s3132_s1 + $0x198] sm:$0xff]   ;;  %v2736_v5 = vld [vmem:[%s3133_s0 + $0x8] sm:$0x1f] }
  0x12   :  { %2219 = vmatprep.subr.bf16.mxu1 %v2371_v18  ;;  %992 = vmatprep.mubr.bf16.mxu1 %v275_v51  ;;  %v276_v56 = vcombine.high %v272_v53, %v272_v53  ;;  %v2405_v3 = vld [vmem:[%s3132_s1 + $0x1e0] sm:$0xff]   ;;  %v2407_v6 = vld [vmem:[%s3132_s1 + $0x168] sm:$0xff]   ;;  %v2411_v10 = vld [vmem:[%s3132_s1 + $0x170] sm:$0xff]   ;;  %v2758_v12 = vrot.slane %v2736_v5, %v2656_v35 }
  0x13   :  { %2198 = vmatpush3.bf16.msra.mxu0 %v2370_v17  ;;  %v2404_v4 = vld [vmem:[%s3132_s1 + $0x120] sm:$0xff]   ;;  %v2409_v8 = vld [vmem:[%s3132_s1 + $0x1e8] sm:$0xff]   ;;  %v2413_v13 = vld [vmem:[%s3132_s1 + $0x1f0] sm:$0xff]  }
  0x14   :  { %2199 = vmatprep.subr.bf16.mxu0 %v2373_v20  ;;  %v2406_v7 = vld [vmem:[%s3132_s1 + $0x1a0] sm:$0xff]   ;;  %v2408_v9 = vld [vmem:[%s3132_s1 + $0x128] sm:$0xff]   ;;  %v2412_v14 = vld [vmem:[%s3132_s1 + $0x130] sm:$0xff]   ;;  %v292_v17 = vcombine.high %v2758_v12, %v2758_v12  ;;  %v258_v20 = vrot.slane %v2676_v45, %v2656_v35 }
  0x15   :  { %2220 = vmatpush3.bf16.msra.mxu1 %v2372_v19  ;;  %v2410_v11 = vld [vmem:[%s3132_s1 + $0x1a8] sm:$0xff]   ;;  %v2415_v15 = vld [vmem:[%s3132_s1 + $0x178] sm:$0xff]   ;;  %v2414_v16 = vld [vmem:[%s3132_s1 + $0x1b0] sm:$0xff]  }
  0x16   :  { %2221 = vmatprep.subr.bf16.mxu1 %v2375_v25  ;;  %v2417_v18 = vld [vmem:[%s3132_s1 + $0x1f8] sm:$0xff]   ;;  %v313_v23 = vrot.slane %v292_v17, %v2656_v35  ;;  %v2421_v24 = vld [vmem:[%s3132_s1 + $0x2c0] sm:$0xff]   ;;  %v2430_v39 = vld [vmem:[%s3132_s1 + $0x290] sm:$0xff]  }
  0x17   :  { %2200 = vmatpush3.bf16.msra.mxu0 %v2374_v21  ;;  %v2416_v19 = vld [vmem:[%s3132_s1 + $0x138] sm:$0xff]   ;;  %v2419_v21 = vld [vmem:[%s3132_s1 + $0x240] sm:$0xff]   ;;  %v2439_v46 = vld [vmem:[%s3132_s1 + $0x268] sm:$0xff]  }
  0x18   :  { %2201 = vmatprep.subr.bf16.mxu0 %v2377_v27  ;;  %v2418_v22 = vld [vmem:[%s3132_s1 + $0x1b8] sm:$0xff]   ;;  %v2420_v25 = vld [vmem:[%s3132_s1 + $0x200] sm:$0xff]   ;;  %v2423_v27 = vld [vmem:[%s3132_s1 + $0x248] sm:$0xff]   ;;  %v315_v29 = vcombine.high %v313_v23, %v313_v23 }
  0x19   :  { %2222 = vmatpush3.bf16.msra.mxu1 %v2376_v26  ;;  %v274_v26 = vcombine.high %v258_v20, %v258_v20  ;;  %v2431_v38 = vld [vmem:[%s3132_s1 + $0x258] sm:$0xff]   ;;  %v2435_v42 = vld [vmem:[%s3132_s1 + $0x260] sm:$0xff]   ;;  %v2441_v48 = vld [vmem:[%s3132_s1 + $0x2e8] sm:$0xff]  }
  0x1a   :  { %2223 = vmatprep.subr.bf16.mxu1 %v2379_v31  ;;  %v2425_v31 = vld [vmem:[%s3132_s1 + $0x2c8] sm:$0xff]   ;;  %v2433_v40 = vld [vmem:[%s3132_s1 + $0x2d8] sm:$0xff]   ;;  %v2436_v45 = vld [vmem:[%s3132_s1 + $0x220] sm:$0xff]  }
  0x1b   :  { %2202 = vmatpush3.bf16.msra.mxu0 %v2378_v28  ;;  %v2422_v28 = vld [vmem:[%s3132_s1 + $0x280] sm:$0xff]   ;;  %v2442_v51 = vld [vmem:[%s3132_s1 + $0x2a8] sm:$0xff]   ;;  %vm2012_vm5 = vmor %vm2011_vm4, %vm2010_vm3 }
  0x1c   :  { %2203 = vmatprep.subr.bf16.mxu0 %v2381_v33  ;;  %v2427_v33 = vld [vmem:[%s3132_s1 + $0x250] sm:$0xff]   ;;  %v2471_v17 = vld [vmem:[%s3134_s3 + $0x138] ss:$52 sps:$4 sm:$0xff]   ;;  %vm2014_vm7 = vmor %vm2013_vm6, %vm2012_vm5 }
  0x1d   :  { %2224 = vmatpush3.bf16.msra.mxu1 %v2380_v32  ;;  %v2424_v32 = vld [vmem:[%s3132_s1 + $0x208] sm:$0xff]   ;;  %vm2016_vm9 = vmor %vm2015_vm8, %vm2014_vm7 }
  0x1e   :  { %2225 = vmatprep.subr.bf16.mxu1 %v2383_v36  ;;  %v2429_v36 = vld [vmem:[%s3132_s1 + $0x2d0] sm:$0xff]   ;;  %vm2018_vm11 = vmor %vm2017_vm10, %vm2016_vm9 }
  0x1f   :  { %2204 = vmatpush3.bf16.msra.mxu0 %v2382_v34  ;;  %v2426_v34 = vld [vmem:[%s3132_s1 + $0x288] sm:$0xff]  }
  0x20   :  { %2233 = vmatprep.subr.bf16.mxu0 %v2387_v41  ;;  %v2432_v41 = vld [vmem:[%s3132_s1 + $0x218] sm:$0xff]  }
  0x21   :  { %2226 = vmatpush3.bf16.msra.mxu1 %v2384_v37  ;;  %v2428_v37 = vld [vmem:[%s3132_s1 + $0x210] sm:$0xff]  }
  0x22   :  { %2255 = vmatprep.subr.bf16.mxu1 %v2389_v44  ;;  %953 = vmatmul.mubr.bf16.vlgmr.msra.gmra.mrb[0].mxu0 %v251_v43  ;;  %v2434_v43 = vld [vmem:[%s3132_s1 + $0x298] sm:$0xff]   ;;  %v2437_v44 = vld [vmem:[%s3132_s1 + $0x2e0] sm:$0xff]  }
  0x23   :  { %2234 = vmatpush3.bf16.msra.mxu0 %v2388_v47  ;;  %1032 = vmatprep.mubr.bf16.mxu0 %v272_v53  ;;  %v2438_v47 = vld [vmem:[%s3132_s1 + $0x2a0] sm:$0xff]   ;;  %v2444_v53 = vld [vmem:[%s3132_s1 + $0x230] sm:$0xff]  }
  0x24   :  { %993 = vmatmul.mubr.bf16.vlgmr.msra.gmra.mrb[0].mxu1 %v273_v49  ;;  %2235 = vmatprep.subr.bf16.mxu0 %v2391_v50  ;;  %v2440_v49 = vld [vmem:[%s3132_s1 + $0x228] sm:$0xff]   ;;  %v2443_v50 = vld [vmem:[%s3132_s1 + $0x270] sm:$0xff]  }
  0x25   :  { %2256 = vmatpush3.bf16.msra.mxu1 %v2390_v52  ;;  %1072 = vmatprep.mubr.bf16.mxu1 %v276_v56  ;;  %v2445_v52 = vld [vmem:[%s3132_s1 + $0x2f0] sm:$0xff]   ;;  %v2449_v56 = vld [vmem:[%s3132_s1 + $0x2f8] sm:$0xff]  }
  0x26   :  { %2257 = vmatprep.subr.bf16.mxu1 %v2393_v54  ;;  %v2447_v54 = vld [vmem:[%s3132_s1 + $0x278] sm:$0xff]  }
  0x27   :  { %2236 = vmatpush3.bf16.msra.mxu0 %v2392_v55  ;;  %v2446_v55 = vld [vmem:[%s3132_s1 + $0x2b0] sm:$0xff]  }
  0x28   :  { %2237 = vmatprep.subr.bf16.mxu0 %v2395_v57  ;;  %v2448_v57 = vld [vmem:[%s3132_s1 + $0x238] sm:$0xff]  }
  0x29   :  { %2258 = vmatpush3.bf16.msra.mxu1 %v2394_v58  ;;  %v299_v58 = vrot.slane %v2758_v12, %v2656_v35  ;;  %v2470_v12 = vld [vmem:[%s3134_s3 + $0xdc] ss:$52 sps:$4 sm:$0xff]  }
  0x2a   :  { %2259 = vmatprep.subr.bf16.mxu1 %v2397_v59  ;;  %v2450_v59 = vld [vmem:[%s3132_s1 + $0x2b8] sm:$0xff]  }
  0x2b   :  { %2238 = vmatpush3.bf16.msra.mxu0 %v2396_v60  ;;  %v277_v60 = vcombine.high %v2736_v5, %v2736_v5  ;;  %v2456_v5 = vld [vmem:[%s3134_s3 + $0x8] ss:$52 sps:$4 sm:$0xff]  }
  0x2c   :  { %2239 = vmatprep.subr.bf16.mxu0 %v2399_v61  ;;  %v2451_v61 = vld [vmem:[%s3132_s1 + $0x300] sm:$0xff]  }
  0x2d   :  { %2260 = vmatpush3.bf16.msra.mxu1 %v2398_v62  ;;  %v2530_v62 = vmov 0.0  }
  0x2e   :  { %2261 = vmatprep.subr.bf16.mxu1 %v2401_v63  ;;  %v314_v63 = vcombine.high %v299_v58, %v299_v58 }
  0x2f   :  { %2240 = vmatpush3.bf16.msra.mxu0 %v2400_v0  ;;  %v291_v0 = vrot.slane %v277_v60, %v2656_v35 }
  0x30   :  { %2241 = vmatprep.subr.bf16.mxu0 %v2403_v1  ;;  %v2452_v1 = vld [vmem:[%s3132_s1 + $0x308] sm:$0xff]  }
  0x31   :  { %2262 = vmatpush3.bf16.msra.mxu1 %v2402_v2  ;;  %v306_v2 = vrot.slane %v291_v0, %v2656_v35 }
  0x32   :  { %2263 = vmatprep.subr.bf16.mxu1 %v2405_v3  ;;  %v2453_v3 = vld [vmem:[%s3134_s3] ss:$52 sps:$4 sm:$0xff]  }
  0x33   :  { %2242 = vmatpush3.bf16.msra.mxu0 %v2404_v4  ;;  %v2455_v4 = vld [vmem:[%s3134_s3 + $0x4] ss:$52 sps:$4 sm:$0xff]  }
  0x34   :  { %2243 = vmatprep.subr.bf16.mxu0 %v2407_v6  ;;  %v2458_v6 = vld [vmem:[%s3134_s3 + $0xc] ss:$52 sps:$4 sm:$0xff]  }
  0x35   :  { %2264 = vmatpush3.bf16.msra.mxu1 %v2406_v7  ;;  %v2459_v7 = vld [vmem:[%s3134_s3 + $0x68] ss:$52 sps:$4 sm:$0xff]  }
  0x36   :  { %2265 = vmatprep.subr.bf16.mxu1 %v2409_v8  ;;  %v2461_v8 = vld [vmem:[%s3134_s3 + $0x6c] ss:$52 sps:$4 sm:$0xff]  }
  0x37   :  { %2244 = vmatpush3.bf16.msra.mxu0 %v2408_v9  ;;  %v2462_v9 = vld [vmem:[%s3134_s3 + $0x70] ss:$52 sps:$4 sm:$0xff]  }
  0x38   :  { %2245 = vmatprep.subr.bf16.mxu0 %v2411_v10  ;;  %v2464_v10 = vld [vmem:[%s3134_s3 + $0x74] ss:$52 sps:$4 sm:$0xff]  }
  0x39   :  { %2266 = vmatpush3.bf16.msra.mxu1 %v2410_v11  ;;  %v2467_v11 = vld [vmem:[%s3134_s3 + $0xd4] ss:$52 sps:$4 sm:$0xff]  }
  0x3a   :  { %2267 = vmatprep.subr.bf16.mxu1 %v2413_v13  ;;  %v2465_v13 = vld [vmem:[%s3134_s3 + $0xd0] ss:$52 sps:$4 sm:$0xff]  }
  0x3b   :  { %2246 = vmatpush3.bf16.msra.mxu0 %v2412_v14  ;;  %v2468_v14 = vld [vmem:[%s3134_s3 + $0xd8] ss:$52 sps:$4 sm:$0xff]  }
  0x3c   :  { %2247 = vmatprep.subr.bf16.mxu0 %v2415_v15  ;;  %v2473_v15 = vld [vmem:[%s3134_s3 + $0x13c] ss:$52 sps:$4 sm:$0xff]  }
  0x3d   :  { %2268 = vmatpush3.bf16.msra.mxu1 %v2414_v16  ;;  %v2476_v16 = vld [vmem:[%s3134_s3 + $0x144] ss:$52 sps:$4 sm:$0xff]  }
  0x3e   :  { %2269 = vmatprep.subr.bf16.mxu1 %v2417_v18  ;;  %v2474_v18 = vld [vmem:[%s3134_s3 + $0x140] ss:$52 sps:$4 sm:$0xff]  }
  0x3f   :  { %2248 = vmatpush3.bf16.msra.mxu0 %v2416_v19  ;;  %v2479_v19 = vld [vmem:[%s3134_s3 + $0x14] ss:$52 sps:$4 sm:$0xff]  }
  0x40   :  { %2277 = vmatprep.subr.bf16.mxu0 %v2419_v21  ;;  %v2482_v21 = vld [vmem:[%s3134_s3 + $0x1c] ss:$52 sps:$4 sm:$0xff]  }
  0x41   :  { %2270 = vmatpush3.bf16.msra.mxu1 %v2418_v22 }
  0x42   :  { %1033 = vmatmul.mubr.bf16.vlgmr.msra.gmra.mrb[4].mxu0 %v258_v20  ;;  %2299 = vmatprep.subr.bf16.mxu1 %v2421_v24  ;;  %v2532_v20 = vmov 0  }
  0x43   :  { %2278 = vmatpush3.bf16.msra.mxu0 %v2420_v25  ;;  %1112 = vmatprep.mubr.bf16.mxu0 %v313_v23  ;;  %v2024_v23 = vld [vmem:[%s3135_s2] ss:$0 sm:$0xff] }
  0x44   :  { %1073 = vmatmul.mubr.bf16.vlgmr.msra.gmra.mrb[4].mxu1 %v274_v26  ;;  %2279 = vmatprep.subr.bf16.mxu0 %v2423_v27 }
  0x45   :  { %2300 = vmatpush3.bf16.msra.mxu1 %v2422_v28  ;;  %1152 = vmatprep.mubr.bf16.mxu1 %v315_v29 }
  0x46   :  { %2301 = vmatprep.subr.bf16.mxu1 %v2425_v31 }
  0x47   :  { %2280 = vmatpush3.bf16.msra.mxu0 %v2424_v32 }
  0x48   :  { %2281 = vmatprep.subr.bf16.mxu0 %v2427_v33 }
  0x49   :  { %2302 = vmatpush3.bf16.msra.mxu1 %v2426_v34 }
  0x4a   :  { %2303 = vmatprep.subr.bf16.mxu1 %v2429_v36 }
  0x4b   :  { %2282 = vmatpush3.bf16.msra.mxu0 %v2428_v37 }
  0x4c   :  { %2283 = vmatprep.subr.bf16.mxu0 %v2431_v38 }
  0x4d   :  { %2304 = vmatpush3.bf16.msra.mxu1 %v2430_v39 }
  0x4e   :  { %2305 = vmatprep.subr.bf16.mxu1 %v2433_v40 }
  0x4f   :  { %2284 = vmatpush3.bf16.msra.mxu0 %v2432_v41 }
  0x50   :  { %2285 = vmatprep.subr.bf16.mxu0 %v2435_v42 }
  0x51   :  { %2306 = vmatpush3.bf16.msra.mxu1 %v2434_v43 }
  0x52   :  { %2307 = vmatprep.subr.bf16.mxu1 %v2437_v44 }
  0x53   :  { %2286 = vmatpush3.bf16.msra.mxu0 %v2436_v45 }
  0x54   :  { %2287 = vmatprep.subr.bf16.mxu0 %v2439_v46 }
  0x55   :  { %2308 = vmatpush3.bf16.msra.mxu1 %v2438_v47 }
  0x56   :  { %2309 = vmatprep.subr.bf16.mxu1 %v2441_v48 }
  0x57   :  { %2288 = vmatpush3.bf16.msra.mxu0 %v2440_v49 }
  0x58   :  { %2289 = vmatprep.subr.bf16.mxu0 %v2443_v50 }
  0x59   :  { %2310 = vmatpush3.bf16.msra.mxu1 %v2442_v51 }
  0x5a   :  { %2311 = vmatprep.subr.bf16.mxu1 %v2445_v52 }
  0x5b   :  { %2290 = vmatpush3.bf16.msra.mxu0 %v2444_v53 }
  0x5c   :  { %2291 = vmatprep.subr.bf16.mxu0 %v2447_v54 }
  0x5d   :  { %2312 = vmatpush3.bf16.msra.mxu1 %v2446_v55 }
  0x5e   :  { %2313 = vmatprep.subr.bf16.mxu1 %v2449_v56 }
  0x5f   :  { %2292 = vmatpush3.bf16.msra.mxu0 %v2448_v57 }
  0x60   :  { %2329 = vmatprep.subr.bf16.mxu0 %v2530_v62 }
  0x61   :  { %2314 = vmatpush3.bf16.msra.mxu1 %v2450_v59 }
  0x62   :  { %1113 = vmatmul.mubr.bf16.vlgmr.msra.gmra.mrb[8].mxu0 %v299_v58  ;;  %1594 = vmatprep.subr.bf16.mxu1 %v2455_v4 }
  0x63   :  { %2330 = vmatpush3.bf16.msra.mxu0 %v2451_v61  ;;  %2333 = vmatprep.mubr.msk.bf16.mxu0 %vm2531_vm0, %v2530_v62 }
  0x64   :  { %1153 = vmatmul.mubr.bf16.vlgmr.msra.gmra.mrb[8].mxu1 %v314_v63  ;;  %2331 = vmatprep.subr.bf16.mxu0 %v2530_v62 }
  0x65   :  { %1595 = vmatpush1.bf16.msra.mxu1 %v2453_v3  ;;  %1626 = vmatprep.mubr.bf16.mxu1 %v2532_v20  ;;  %v2480_v3 = vld [vmem:[%s3134_s3 + $0x18] ss:$52 sps:$4 sm:$0xff]  }
  0x66   :  { %1596 = vmatprep.subr.bf16.mxu1 %v2461_v8  ;;  %v2483_v8 = vld [vmem:[%s3134_s3 + $0x78] ss:$52 sps:$4 sm:$0xff]  }
  0x67   :  { %2332 = vmatpush3.bf16.msra.mxu0 %v2452_v1 }
  0x68   :  { %1635 = vmatprep.subr.bf16.mxu0 %v2458_v6  ;;  %v2485_v6 = vld [vmem:[%s3134_s3 + $0x7c] ss:$52 sps:$4 sm:$0xff]  }
  0x69   :  { %1597 = vmatpush1.bf16.msra.mxu1 %v2459_v7  ;;  %v2488_v7 = vld [vmem:[%s3134_s3 + $0x84] ss:$52 sps:$4 sm:$0xff]  }
  0x6a   :  { %2334 = vmatmul.mubr.msk.bf16.vlgmr.msra.gmra.mrb[12].mxu0 %vm916_vm1, %v306_v2  ;;  %1598 = vmatprep.subr.bf16.mxu1 %v2467_v11  ;;  %v2477_v2 = vld [vmem:[%s3134_s3 + $0x10] ss:$52 sps:$4 sm:$0xff]   ;;  %v2494_v11 = vld [vmem:[%s3134_s3 + $0xec] ss:$52 sps:$4 sm:$0xff]  }
  0x6b   :  { %1636 = vmatpush1.bf16.msra.mxu0 %v2456_v5  ;;  %1667 = vmatprep.mubr.bf16.mxu0 %v2532_v20 }
  0x6c   :  { %1637 = vmatprep.subr.bf16.mxu0 %v2464_v10  ;;  %v2491_v10 = vld [vmem:[%s3134_s3 + $0xe4] ss:$52 sps:$4 sm:$0xff]  }
  0x6d   :  { %1599 = vmatpush1.bf16.msra.mxu1 %v2465_v13  ;;  %v2492_v13 = vld [vmem:[%s3134_s3 + $0xe8] ss:$52 sps:$4 sm:$0xff]  }
  0x6e   :  { %1600 = vmatprep.subr.bf16.mxu1 %v2473_v15  ;;  %v2500_v15 = vld [vmem:[%s3134_s3 + $0x154] ss:$52 sps:$4 sm:$0xff]  }
  0x6f   :  { %1638 = vmatpush1.bf16.msra.mxu0 %v2462_v9  ;;  %v2486_v9 = vld [vmem:[%s3134_s3 + $0x80] ss:$52 sps:$4 sm:$0xff]  }
  0x70   :  { %1639 = vmatprep.subr.bf16.mxu0 %v2470_v12  ;;  %v2489_v12 = vld [vmem:[%s3134_s3 + $0xe0] ss:$52 sps:$4 sm:$0xff]  }
  0x71   :  { %1601 = vmatpush1.bf16.msra.mxu1 %v2471_v17  ;;  %v2498_v17 = vld [vmem:[%s3134_s3 + $0x150] ss:$52 sps:$4 sm:$0xff]  }
  0x72   :  { %1676 = vmatprep.subr.bf16.mxu1 %v2479_v19  ;;  %v2506_v19 = vld [vmem:[%s3134_s3 + $0x2c] ss:$52 sps:$4 sm:$0xff]  }
  0x73   :  { %1640 = vmatpush1.bf16.msra.mxu0 %v2468_v14  ;;  %v2497_v14 = vld [vmem:[%s3134_s3 + $0x14c] ss:$52 sps:$4 sm:$0xff]  }
  0x74   :  { %1641 = vmatprep.subr.bf16.mxu0 %v2476_v16  ;;  %v2495_v16 = vld [vmem:[%s3134_s3 + $0x148] ss:$52 sps:$4 sm:$0xff]  }
  0x77   :  { %1642 = vmatpush1.bf16.msra.mxu0 %v2474_v18  ;;  %v2503_v18 = vld [vmem:[%s3134_s3 + $0x24] ss:$52 sps:$4 sm:$0xff]  }
  0x78   :  { %1717 = vmatprep.subr.bf16.mxu0 %v2482_v21  ;;  %v2501_v21 = vld [vmem:[%s3134_s3 + $0x20] ss:$52 sps:$4 sm:$0xff]  }
  0xf5   :  { %v2205_v22 = vpop.f32.mrb[0].mxu0 }
  0xf6   :  { %v2206_v24 = vpop.f32.mrb[1].mxu0 }
  0xf7   :  { %v2207_v25 = vadd.f32 %v2206_v24, %v2205_v22  ;;  %v2208_v26 = vpop.f32.mrb[2].mxu0  ;;  %v2227_v27 = vpop.f32.mrb[0].mxu1  ;;  %v2504_v22 = vld [vmem:[%s3134_s3 + $0x28] ss:$52 sps:$4 sm:$0xff]  }
  0xf8   :  { %v2209_v28 = vpop.f32.mrb[3].mxu0  ;;  %v2228_v29 = vpop.f32.mrb[1].mxu1  ;;  %v2512_v24 = vld [vmem:[%s3134_s3 + $0x94] ss:$52 sps:$4 sm:$0xff]   ;;  %v2510_v26 = vld [vmem:[%s3134_s3 + $0x90] ss:$52 sps:$4 sm:$0xff]  }
  0xf9   :  { %v955_v31 = vadd.f32 %v2207_v25, %v2024_v23  ;;  %v2229_v32 = vadd.f32 %v2228_v29, %v2227_v27  ;;  %v2230_v33 = vpop.f32.mrb[2].mxu1  ;;  %v2509_v23 = vld [vmem:[%s3134_s3 + $0x8c] ss:$52 sps:$4 sm:$0xff]   ;;  %v2507_v25 = vld [vmem:[%s3134_s3 + $0x88] ss:$52 sps:$4 sm:$0xff]  }
  0xfa   :  { %v2231_v34 = vpop.f32.mrb[3].mxu1  ;;  %v2515_v27 = vld [vmem:[%s3134_s3 + $0xf4] ss:$52 sps:$4 sm:$0xff]   ;;  %v2518_v28 = vld [vmem:[%s3134_s3 + $0xfc] ss:$52 sps:$4 sm:$0xff]  }
  0xfb   :  { %v995_v36 = vadd.f32 %v2229_v32, %v955_v31  ;;  %v2513_v29 = vld [vmem:[%s3134_s3 + $0xf0] ss:$52 sps:$4 sm:$0xff]   ;;  %v2516_v31 = vld [vmem:[%s3134_s3 + $0xf8] ss:$52 sps:$4 sm:$0xff]   ;;  %v2522_v34 = vld [vmem:[%s3134_s3 + $0x160] ss:$52 sps:$4 sm:$0xff]  }
  0xfc   :  { %v2521_v32 = vld [vmem:[%s3134_s3 + $0x15c] ss:$52 sps:$4 sm:$0xff]   ;;  %v2519_v33 = vld [vmem:[%s3134_s3 + $0x158] ss:$52 sps:$4 sm:$0xff]  }
 0x115   :  { %v2249_v37 = vpop.f32.mrb[4].mxu0 }
 0x116   :  { %v2250_v38 = vpop.f32.mrb[5].mxu0 }
 0x117   :  { %v2251_v39 = vadd.f32 %v2250_v38, %v2249_v37  ;;  %v2252_v40 = vpop.f32.mrb[6].mxu0  ;;  %v2271_v41 = vpop.f32.mrb[4].mxu1  ;;  %v2526_v37 = vld [vmem:[%s3134_s3 + $0x98] ss:$52 sps:$4 sm:$0xff]   ;;  %v2527_v38 = vld [vmem:[%s3134_s3 + $0x100] ss:$52 sps:$4 sm:$0xff]  }
 0x118   :  { %v2253_v42 = vpop.f32.mrb[7].mxu0  ;;  %v2272_v43 = vpop.f32.mrb[5].mxu1  ;;  %v1263_v40 = vsub.s32 0, %v2641_v30 }
 0x119   :  { %v1035_v44 = vadd.f32 %v2251_v39, %v995_v36  ;;  %v2273_v45 = vadd.f32 %v2272_v43, %v2271_v41  ;;  %v2274_v46 = vpop.f32.mrb[6].mxu1  ;;  %v2525_v36 = vld [vmem:[%s3134_s3 + $0x30] ss:$52 sps:$4 sm:$0xff]   ;;  %v2528_v39 = vld [vmem:[%s3134_s3 + $0x168] ss:$52 sps:$4 sm:$0xff]   ;;  %v1271_v41 = vsub.s32 2, %v2641_v30 }
 0x11a   :  { %v2275_v47 = vpop.f32.mrb[7].mxu1  ;;  %v1257_v42 = vld [vmem:[%s3136_s4] sm:$0xff]  ;;  %v1267_v43 = vsub.s32 1, %v2641_v30 }
 0x11b   :  { %v1075_v48 = vadd.f32 %v2273_v45, %v1035_v44  ;;  %v1275_v44 = vsub.s32 3, %v2641_v30  ;;  %v1264_v45 = vrot.slane %v1257_v42, %v1263_v40 }
 0x11c   :  { %v1268_v46 = vrot.slane %v1257_v42, %v1267_v43 }
 0x11d   :  { %v1276_v47 = vrot.slane %v1257_v42, %v1275_v44 }
 0x135   :  { %v2293_v49 = vpop.f32.mrb[8].mxu0 }
 0x136   :  { %v2294_v50 = vpop.f32.mrb[9].mxu0 }
 0x137   :  { %v2295_v51 = vadd.f32 %v2294_v50, %v2293_v49  ;;  %v2315_v52 = vpop.f32.mrb[8].mxu1  ;;  %v2296_v53 = vpop.f32.mrb[10].mxu0 }
 0x138   :  { %v2316_v54 = vpop.f32.mrb[9].mxu1  ;;  %v2297_v55 = vpop.f32.mrb[11].mxu0 }
 0x139   :  { %v1115_v56 = vadd.f32 %v2295_v51, %v1075_v48  ;;  %v2317_v57 = vadd.f32 %v2316_v54, %v2315_v52  ;;  %v2318_v58 = vpop.f32.mrb[10].mxu1 }
 0x13a   :  { %v2319_v59 = vpop.f32.mrb[11].mxu1 }
 0x13b   :  { %v1155_v60 = vadd.f32 %v2317_v57, %v1115_v56 }
 0x13d   :  { %v1194_v61 = vpop.f32.mrb[12].mxu0 }
 0x13e   :  { %v1195_v63 = vadd.f32 %v1194_v61, %v1155_v60  ;;  %v2335_v0 = vpop.f32.mrb[13].mxu0 }
 0x13f   :  { %v1197_v1 = vpop.f32.mrb[14].mxu0 }
 0x140   :  { %v2963_v4 = vpack.c.bf16 %v1195_v63, %v1195_v63  ;;  %v2336_v5 = vpop.f32.mrb[15].mxu0 }
 0x141   :  { %v1279_v5 = vsub.s32 4, %v2641_v30 }
 0x142   :  { %2176 = vmatmul.mubr.msk.bf16.vlgmr.msra.gmra.mrb[12].mxu1 %vm1590_vm2, %v2963_v4  ;;  %2177 = vmatmul.mubr.msk.bf16.vlgmr.msra.gmra.mrb[16].mxu0 %vm1590_vm2, %v2963_v4 }
 0x143   :  { %1677 = vmatpush1.bf16.msra.mxu1 %v2477_v2  ;;  %1718 = vmatpush1.bf16.msra.mxu0 %v2480_v3 }
 0x144   :  { %1678 = vmatprep.subr.bf16.mxu1 %v2485_v6  ;;  %1719 = vmatprep.subr.bf16.mxu0 %v2488_v7  ;;  %v1287_v6 = vsub.s32 6, %v2641_v30 }
 0x145   :  { %1708 = vmatprep.mubr.bf16.mxu1 %v2532_v20  ;;  %1749 = vmatprep.mubr.bf16.mxu0 %v2532_v20 }
 0x147   :  { %1679 = vmatpush1.bf16.msra.mxu1 %v2483_v8  ;;  %1720 = vmatpush1.bf16.msra.mxu0 %v2486_v9  ;;  %v1283_v8 = vsub.s32 5, %v2641_v30  ;;  %v1291_v9 = vsub.s32 7, %v2641_v30 }
 0x148   :  { %1680 = vmatprep.subr.bf16.mxu1 %v2491_v10  ;;  %1721 = vmatprep.subr.bf16.mxu0 %v2494_v11  ;;  %v1280_v10 = vrot.slane %v1257_v42, %v1279_v5  ;;  %v1288_v11 = vrot.slane %v1257_v42, %v1287_v6 }
 0x14b   :  { %1681 = vmatpush1.bf16.msra.mxu1 %v2489_v12  ;;  %1722 = vmatpush1.bf16.msra.mxu0 %v2492_v13  ;;  %v1284_v12 = vrot.slane %v1257_v42, %v1283_v8  ;;  %v1292_v13 = vrot.slane %v1257_v42, %v1291_v9 }
 0x14c   :  { %1682 = vmatprep.subr.bf16.mxu1 %v2497_v14  ;;  %1723 = vmatprep.subr.bf16.mxu0 %v2500_v15 }
 0x14f   :  { %1683 = vmatpush1.bf16.msra.mxu1 %v2495_v16  ;;  %1724 = vmatpush1.bf16.msra.mxu0 %v2498_v17 }
 0x150   :  { %1758 = vmatprep.subr.bf16.mxu1 %v2503_v18  ;;  %1799 = vmatprep.subr.bf16.mxu0 %v2506_v19 }
 0x152   :  { %2178 = vmatmul.mubr.msk.bf16.vlgmr.msra.gmra.mrb[16].mxu1 %vm1590_vm2, %v2963_v4  ;;  %2179 = vmatmul.mubr.msk.bf16.vlgmr.msra.gmra.mrb[20].mxu0 %vm1590_vm2, %v2963_v4 }
 0x153   :  { %1759 = vmatpush1.bf16.msra.mxu1 %v2501_v21  ;;  %1800 = vmatpush1.bf16.msra.mxu0 %v2504_v22 }
 0x154   :  { %1760 = vmatprep.subr.bf16.mxu1 %v2509_v23  ;;  %1801 = vmatprep.subr.bf16.mxu0 %v2512_v24 }
 0x155   :  { %1790 = vmatprep.mubr.bf16.mxu1 %v2532_v20  ;;  %1831 = vmatprep.mubr.bf16.mxu0 %v2532_v20  ;;  %v2524_v20 = vld [vmem:[%s3134_s3 + $0x164] ss:$52 sps:$4 sm:$0xff]  }
 0x157   :  { %1761 = vmatpush1.bf16.msra.mxu1 %v2507_v25  ;;  %1802 = vmatpush1.bf16.msra.mxu0 %v2510_v26 }
 0x158   :  { %1762 = vmatprep.subr.bf16.mxu1 %v2515_v27  ;;  %1803 = vmatprep.subr.bf16.mxu0 %v2518_v28 }
 0x15b   :  { %1763 = vmatpush1.bf16.msra.mxu1 %v2513_v29  ;;  %1804 = vmatpush1.bf16.msra.mxu0 %v2516_v31 }
 0x15c   :  { %1764 = vmatprep.subr.bf16.mxu1 %v2521_v32  ;;  %1805 = vmatprep.subr.bf16.mxu0 %v2524_v20 }
 0x15f   :  { %1765 = vmatpush1.bf16.msra.mxu1 %v2519_v33  ;;  %1806 = vmatpush1.bf16.msra.mxu0 %v2522_v34 }
 0x160   :  { %2337 = vmatprep.subr.bf16.mxu1 %v2530_v62 }
 0x162   :  { %2180 = vmatmul.mubr.msk.bf16.vlgmr.msra.gmra.mrb[20].mxu1 %vm1590_vm2, %v2963_v4  ;;  %2181 = vmatmul.mubr.msk.bf16.vlgmr.msra.gmra.mrb[24].mxu0 %vm1590_vm2, %v2963_v4 }
 0x163   :  { %2338 = vmatpush3.bf16.msra.mxu1 %v2525_v36  ;;  %2345 = vmatprep.mubr.msk.bf16.mxu1 %vm2531_vm0, %v2530_v62 }
 0x164   :  { %2339 = vmatprep.subr.bf16.mxu1 %v2530_v62 }
 0x167   :  { %2340 = vmatpush3.bf16.msra.mxu1 %v2526_v37  ;;  %v1258_v37 = vld [vmem:[%s3136_s4 + $0x8] sm:$0x1f] }
 0x168   :  { %2341 = vmatprep.subr.bf16.mxu1 %v2530_v62 }
 0x16b   :  { %2342 = vmatpush3.bf16.msra.mxu1 %v2527_v38 }
 0x16c   :  { %2343 = vmatprep.subr.bf16.mxu1 %v2530_v62  ;;  %v1272_v62 = vrot.slane %v1257_v42, %v1271_v41  ;;  %v1296_v42 = vrot.slane %v1258_v37, %v1263_v40 }
 0x16f   :  { %2344 = vmatpush3.bf16.msra.mxu1 %v2528_v39 }
 0x172   :  { %2346 = vmatmul.mubr.msk.bf16.vlgmr.msra.gmra.mrb[24].mxu1 %vm1590_vm2, %v2963_v4 }
 0x215   :  { %v1628_v48 = vpop.f32.mrb[12].mxu1  ;;  %v1669_v49 = vpop.f32.mrb[16].mxu0 }
 0x216   :  { %v1629_v50 = vadd.f32 %v1628_v48, %v1264_v45  ;;  %v1670_v51 = vadd.f32 %v1669_v49, %v1272_v62  ;;  %v1630_v52 = vpop.f32.mrb[13].mxu1  ;;  %v1671_v53 = vpop.f32.mrb[17].mxu0  ;;  %v1304_v45 = vrot.slane %v1258_v37, %v1271_v41 }
 0x217   :  { %v1631_v54 = vadd.f32 %v1630_v52, %v1268_v46  ;;  %v1672_v55 = vadd.f32 %v1671_v53, %v1276_v47  ;;  %v1632_v56 = vpop.f32.mrb[14].mxu1  ;;  %v1673_v57 = vpop.f32.mrb[18].mxu0  ;;  %v1300_v46 = vrot.slane %v1258_v37, %v1267_v43  ;;  %v1308_v47 = vrot.slane %v1258_v37, %v1275_v44 }
 0x218   :  { %v1880_v58 = vmax.f32 %v1629_v50, 0.0  ;;  %v1882_v59 = vmax.f32 %v1670_v51, 0.0  ;;  %v1633_v60 = vpop.f32.mrb[15].mxu1  ;;  %v1674_v61 = vpop.f32.mrb[19].mxu0 }
 0x219   :  { %v1881_v63 = vmax.f32 %v1631_v54, 0.0  ;;  %v1883_v0 = vmax.f32 %v1672_v55, 0.0 }
 0x21b   :  { %v2183_v1 = vpack.c.bf16 %v1881_v63, %v1880_v58  ;;  %v2184_v2 = vpack.c.bf16 %v1883_v0, %v1882_v59 }
 0x21d   :  { %v1929_v3 = vrot.slane %v2183_v1, %v2656_v35  ;;  %v1936_v4 = vrot.slane %v2184_v2, %v2656_v35  ;;  %v1312_v1 = vrot.slane %v1258_v37, %v1279_v5 }
 0x21f   :  { %v1951_v7 = vcombine.low %v1929_v3, %v1936_v4 }
 0x221   :  { %v1959_v38 = vrot.slane %v1951_v7, %v2656_v35 }
 0x225   :  { %v1710_v14 = vpop.f32.mrb[16].mxu1  ;;  %v1751_v15 = vpop.f32.mrb[20].mxu0 }
 0x226   :  { %v1711_v16 = vadd.f32 %v1710_v14, %v1280_v10  ;;  %v1752_v17 = vadd.f32 %v1751_v15, %v1288_v11  ;;  %v1712_v18 = vpop.f32.mrb[17].mxu1  ;;  %v1753_v19 = vpop.f32.mrb[21].mxu0 }
 0x227   :  { %v1713_v21 = vadd.f32 %v1712_v18, %v1284_v12  ;;  %v1754_v22 = vadd.f32 %v1753_v19, %v1292_v13  ;;  %v1714_v23 = vpop.f32.mrb[18].mxu1  ;;  %v1755_v24 = vpop.f32.mrb[22].mxu0 }
 0x228   :  { %v1884_v25 = vmax.f32 %v1711_v16, 0.0  ;;  %v1886_v26 = vmax.f32 %v1752_v17, 0.0  ;;  %v1715_v27 = vpop.f32.mrb[19].mxu1  ;;  %v1756_v28 = vpop.f32.mrb[23].mxu0 }
 0x229   :  { %v1885_v29 = vmax.f32 %v1713_v21, 0.0  ;;  %v1887_v31 = vmax.f32 %v1754_v22, 0.0 }
 0x22b   :  { %v2185_v32 = vpack.c.bf16 %v1885_v29, %v1884_v25  ;;  %v2186_v20 = vpack.c.bf16 %v1887_v31, %v1886_v26 }
 0x22d   :  { %v1943_v33 = vrot.slane %v2185_v32, %v2656_v35  ;;  %v1950_v34 = vrot.slane %v2186_v20, %v2656_v35 }
 0x22f   :  { %v1952_v36 = vcombine.low %v1943_v33, %v1950_v34 }
 0x231   :  { %v1966_v39 = vrot.slane %v1952_v36, %v2656_v35 }
 0x233   :  { %v1967_v62 = vcombine.low %v1959_v38, %v1966_v39 }
 0x235   :  { %2009 = vst [vmem:[%s3137_s5] sm:$0xff] %v1967_v62  ;;  %v1792_v48 = vpop.f32.mrb[20].mxu1  ;;  %v1833_v49 = vpop.f32.mrb[24].mxu0 }
 0x236   :  { %v1793_v50 = vadd.f32 %v1792_v48, %v1296_v42  ;;  %v1834_v51 = vadd.f32 %v1833_v49, %v1304_v45  ;;  %v1794_v52 = vpop.f32.mrb[21].mxu1  ;;  %v1835_v40 = vpop.f32.mrb[25].mxu0 }
 0x237   :  { %v1795_v53 = vadd.f32 %v1794_v52, %v1300_v46  ;;  %v1836_v54 = vadd.f32 %v1835_v40, %v1308_v47  ;;  %v1796_v41 = vpop.f32.mrb[22].mxu1  ;;  %v1837_v55 = vpop.f32.mrb[26].mxu0 }
 0x238   :  { %v1888_v56 = vmax.f32 %v1793_v50, 0.0  ;;  %v1890_v57 = vmax.f32 %v1834_v51, 0.0  ;;  %v1797_v43 = vpop.f32.mrb[23].mxu1  ;;  %v1838_v58 = vpop.f32.mrb[27].mxu0 }
 0x239   :  { %v1889_v30 = vmax.f32 %v1795_v53, 0.0  ;;  %v1891_v44 = vmax.f32 %v1836_v54, 0.0 }
 0x23b   :  { %v2187_v59 = vpack.c.bf16 %v1889_v30, %v1888_v56  ;;  %v2188_v60 = vpack.c.bf16 %v1891_v44, %v1890_v57 }
 0x23d   :  { %v1976_v61 = vrot.slane %v2187_v59, %v2656_v35  ;;  %v1983_v63 = vrot.slane %v2188_v60, %v2656_v35 }
 0x23f   :  { %v1991_v0 = vcombine.low %v1976_v61, %v1983_v63 }
 0x241   :  { %v1998_v11 = vrot.slane %v1991_v0, %v2656_v35 }
 0x245   :  { %v1874_v2 = vpop.f32.mrb[24].mxu1 }
 0x246   :  { %v1875_v3 = vadd.f32 %v1874_v2, %v1312_v1  ;;  %v2347_v4 = vpop.f32.mrb[25].mxu1 }
 0x247   :  { %v1877_v6 = vpop.f32.mrb[26].mxu1 }
 0x248   :  { %v1892_v7 = vmax.f32 %v1875_v3, 0.0  ;;  %v2348_v8 = vpop.f32.mrb[27].mxu1 }
 0x24a   :  { %v1905_v9 = vpack.c.bf16 %v1892_v7, %v1892_v7 }
 0x24c   :  { %v1990_v10 = vrot.slane %v1905_v9, %v2656_v35 }
 0x24e   :  { %v2005_v5 = vrot.slane %v1990_v10, %v2656_v35 }
 0x250   :  { %v2006_v12 = vcombine.low %v1998_v11, %v2005_v5 }
 0x252   :  { %2019 = vst.msk [vmem:[%s3137_s5 + $0x8] sm:$0x1f] %vm2018_vm11, %v2006_v12 }

// kernel: autoencoder_forward.8
= control target key start
LH: loop header
LB: loop body
LE: loop exit
PB: predicated region body
PF: predicated region fallthrough
CT: control target
= control target key end

     0   :  { %v446_v0 = vmov 0.0   ;;  %vm447_vm0 = vmmov 0   ;;  %vm293_vm1 = vcmask 519168   ;;  %vm306_vm2 = vcmask 516096   ;;  %s589_s1 = inlined_call_operand.vmem [shape: bf16[128,128], index: 1, kind: input, shape index: {}]   ;;  %s590_s0 = inlined_call_operand.vmem [shape: bf16[98,128], index: 0, kind: input, shape index: {}]   ;;  %s591_s2 = inlined_call_operand.vmem [shape: f32[1,128], index: 2, kind: input, shape index: {}]   ;;  %s592_s3 = inlined_call_operand.vmem [shape: bf16[98,64], index: 3, kind: output, shape index: {}]  }
   0x1   :  { %369 = vmatprep.subr.bf16.mxu0 %v446_v0  ;;  %v431_v1 = vld [vmem:[%s589_s1] sm:$0xff]   ;;  %413 = vmatprep.subr.bf16.mxu1 %v446_v0  ;;  %v432_v2 = vld [vmem:[%s589_s1 + $0x8] sm:$0xff]   ;;  %v433_v3 = vld [vmem:[%s589_s1 + $0x10] sm:$0xff]  }
   0x2   :  { %385 = vmatprep.mubr.msk.bf16.mxu0 %vm447_vm0, %v446_v0  ;;  %401 = vmatprep.mubr.msk.bf16.mxu1 %vm447_vm0, %v446_v0  ;;  %v434_v4 = vld [vmem:[%s589_s1 + $0x18] sm:$0xff]   ;;  %v435_v5 = vld [vmem:[%s589_s1 + $0x20] sm:$0xff]   ;;  %v436_v6 = vld [vmem:[%s589_s1 + $0x28] sm:$0xff]  }
   0x3   :  { %370 = vmatpush3.bf16.msra.mxu0 %v431_v1  ;;  %421 = vmatpush3.bf16.msra.mxu1 %v431_v1  ;;  %v437_v7 = vld [vmem:[%s589_s1 + $0x30] sm:$0xff]   ;;  %v438_v8 = vld [vmem:[%s589_s1 + $0x38] sm:$0xff]   ;;  %v439_v9 = vld [vmem:[%s590_s0] sm:$0xff]  }
   0x4   :  { %371 = vmatprep.subr.bf16.mxu0 %v446_v0  ;;  %414 = vmatprep.subr.bf16.mxu1 %v446_v0  ;;  %v440_v10 = vld [vmem:[%s590_s0 + $0x20] sm:$0xff]   ;;  %v441_v11 = vld [vmem:[%s590_s0 + $0x8] sm:$0xff]   ;;  %v443_v13 = vld [vmem:[%s590_s0 + $0x10] sm:$0xff]  }
   0x5   :  { %v442_v12 = vld [vmem:[%s590_s0 + $0x28] sm:$0xff]   ;;  %v444_v14 = vld [vmem:[%s590_s0 + $0x30] ss:$0 sps:$4 sm:$0x11]   ;;  %v445_v15 = vld [vmem:[%s590_s0 + $0x18] sm:$0xff]  }
   0x6   :  { %v523_v16 = vld [vmem:[%s591_s2] ss:$0 sm:$0xff] }
   0x7   :  { %372 = vmatpush3.bf16.msra.mxu0 %v432_v2  ;;  %422 = vmatpush3.bf16.msra.mxu1 %v432_v2 }
   0x8   :  { %373 = vmatprep.subr.bf16.mxu0 %v446_v0  ;;  %415 = vmatprep.subr.bf16.mxu1 %v446_v0 }
   0xb   :  { %374 = vmatpush3.bf16.msra.mxu0 %v433_v3  ;;  %423 = vmatpush3.bf16.msra.mxu1 %v433_v3 }
   0xc   :  { %375 = vmatprep.subr.bf16.mxu0 %v446_v0  ;;  %416 = vmatprep.subr.bf16.mxu1 %v446_v0 }
   0xf   :  { %376 = vmatpush3.bf16.msra.mxu0 %v434_v4  ;;  %424 = vmatpush3.bf16.msra.mxu1 %v434_v4 }
  0x10   :  { %377 = vmatprep.subr.bf16.mxu0 %v446_v0  ;;  %417 = vmatprep.subr.bf16.mxu1 %v446_v0 }
  0x13   :  { %378 = vmatpush3.bf16.msra.mxu0 %v435_v5  ;;  %425 = vmatpush3.bf16.msra.mxu1 %v435_v5 }
  0x14   :  { %379 = vmatprep.subr.bf16.mxu0 %v446_v0  ;;  %418 = vmatprep.subr.bf16.mxu1 %v446_v0 }
  0x17   :  { %380 = vmatpush3.bf16.msra.mxu0 %v436_v6  ;;  %426 = vmatpush3.bf16.msra.mxu1 %v436_v6 }
  0x18   :  { %381 = vmatprep.subr.bf16.mxu0 %v446_v0  ;;  %419 = vmatprep.subr.bf16.mxu1 %v446_v0 }
  0x1b   :  { %382 = vmatpush3.bf16.msra.mxu0 %v437_v7  ;;  %427 = vmatpush3.bf16.msra.mxu1 %v437_v7 }
  0x1c   :  { %383 = vmatprep.subr.bf16.mxu0 %v446_v0  ;;  %420 = vmatprep.subr.bf16.mxu1 %v446_v0 }
  0x1f   :  { %384 = vmatpush3.bf16.msra.mxu0 %v438_v8  ;;  %428 = vmatpush3.bf16.msra.mxu1 %v438_v8 }
  0x22   :  { %386 = vmatmul.mubr.bf16.vlgmr.msra.gmra.mrb[0].mxu0 %v439_v9  ;;  %402 = vmatmul.mubr.bf16.vlgmr.msra.gmra.mrb[0].mxu1 %v440_v10 }
  0x23   :  { %389 = vmatprep.mubr.msk.bf16.mxu0 %vm447_vm0, %v446_v0  ;;  %405 = vmatprep.mubr.msk.bf16.mxu1 %vm447_vm0, %v446_v0 }
  0x2a   :  { %390 = vmatmul.mubr.bf16.gmra.mrb[4].mxu0 %v441_v11  ;;  %406 = vmatmul.mubr.bf16.gmra.mrb[4].mxu1 %v442_v12 }
  0x2b   :  { %393 = vmatprep.mubr.msk.bf16.mxu0 %vm447_vm0, %v446_v0  ;;  %409 = vmatprep.mubr.msk.bf16.mxu1 %vm447_vm0, %v446_v0 }
  0x32   :  { %394 = vmatmul.mubr.bf16.gmra.mrb[8].mxu0 %v443_v13  ;;  %410 = vmatmul.mubr.bf16.gmra.mrb[8].mxu1 %v444_v14 }
  0x33   :  { %397 = vmatprep.mubr.msk.bf16.mxu0 %vm447_vm0, %v446_v0 }
  0x3a   :  { %398 = vmatmul.mubr.bf16.gmra.mrb[12].mxu0 %v445_v15 }
  0xf5   :  { %v173_v17 = vpop.f32.mrb[0].mxu0  ;;  %v205_v18 = vpop.f32.mrb[0].mxu1 }
  0xf6   :  { %v174_v19 = vadd.f32 %v523_v16, %v173_v17  ;;  %v387_v20 = vpop.f32.mrb[1].mxu0  ;;  %v206_v21 = vadd.f32 %v523_v16, %v205_v18  ;;  %v403_v22 = vpop.f32.mrb[1].mxu1 }
  0xf7   :  { %v176_v23 = vpop.f32.mrb[2].mxu0  ;;  %v208_v24 = vpop.f32.mrb[2].mxu1 }
  0xf8   :  { %v227_v25 = vmax.f32 %v174_v19, 0.0  ;;  %v177_v26 = vadd.f32 %v523_v16, %v176_v23  ;;  %v388_v27 = vpop.f32.mrb[3].mxu0  ;;  %v235_v28 = vmax.f32 %v206_v21, 0.0  ;;  %v209_v29 = vadd.f32 %v523_v16, %v208_v24  ;;  %v404_v30 = vpop.f32.mrb[3].mxu1 }
  0xfa   :  { %v341_v31 = vpack.c.bf16 %v227_v25, %v227_v25  ;;  %v228_v32 = vmax.f32 %v177_v26, 0.0  ;;  %v349_v33 = vpack.c.bf16 %v235_v28, %v235_v28  ;;  %v236_v34 = vmax.f32 %v209_v29, 0.0 }
  0xfc   :  { %294 = vst.msk [vmem:[%s592_s3] sm:$0xf] %vm293_vm1, %v341_v31  ;;  %v342_v35 = vpack.c.bf16 %v228_v32, %v228_v32  ;;  %302 = vst.msk [vmem:[%s592_s3 + $0x20] sm:$0xf] %vm293_vm1, %v349_v33  ;;  %v350_v36 = vpack.c.bf16 %v236_v34, %v236_v34 }
  0xfd   :  { %v181_v37 = vpop.f32.mrb[4].mxu0  ;;  %v213_v38 = vpop.f32.mrb[4].mxu1 }
  0xfe   :  { %295 = vst.msk [vmem:[%s592_s3 + $0x4] sm:$0xf] %vm293_vm1, %v342_v35  ;;  %v182_v39 = vadd.f32 %v523_v16, %v181_v37  ;;  %v391_v40 = vpop.f32.mrb[5].mxu0  ;;  %303 = vst.msk [vmem:[%s592_s3 + $0x24] sm:$0xf] %vm293_vm1, %v350_v36  ;;  %v214_v41 = vadd.f32 %v523_v16, %v213_v38  ;;  %v407_v42 = vpop.f32.mrb[5].mxu1 }
  0xff   :  { %v184_v43 = vpop.f32.mrb[6].mxu0  ;;  %v216_v44 = vpop.f32.mrb[6].mxu1 }
 0x100   :  { %v229_v45 = vmax.f32 %v182_v39, 0.0  ;;  %v185_v46 = vadd.f32 %v523_v16, %v184_v43  ;;  %v392_v47 = vpop.f32.mrb[7].mxu0  ;;  %v237_v48 = vmax.f32 %v214_v41, 0.0  ;;  %v217_v49 = vadd.f32 %v523_v16, %v216_v44  ;;  %v408_v50 = vpop.f32.mrb[7].mxu1 }
 0x102   :  { %v343_v51 = vpack.c.bf16 %v229_v45, %v229_v45  ;;  %v230_v52 = vmax.f32 %v185_v46, 0.0  ;;  %v351_v53 = vpack.c.bf16 %v237_v48, %v237_v48  ;;  %v238_v54 = vmax.f32 %v217_v49, 0.0 }
 0x104   :  { %296 = vst.msk [vmem:[%s592_s3 + $0x8] sm:$0xf] %vm293_vm1, %v343_v51  ;;  %v344_v55 = vpack.c.bf16 %v230_v52, %v230_v52  ;;  %304 = vst.msk [vmem:[%s592_s3 + $0x28] sm:$0xf] %vm293_vm1, %v351_v53  ;;  %v352_v56 = vpack.c.bf16 %v238_v54, %v238_v54 }
 0x105   :  { %v189_v57 = vpop.f32.mrb[8].mxu0  ;;  %v221_v58 = vpop.f32.mrb[8].mxu1 }
 0x106   :  { %297 = vst.msk [vmem:[%s592_s3 + $0xc] sm:$0xf] %vm293_vm1, %v344_v55  ;;  %v190_v59 = vadd.f32 %v523_v16, %v189_v57  ;;  %v395_v60 = vpop.f32.mrb[9].mxu0  ;;  %305 = vst.msk [vmem:[%s592_s3 + $0x2c] sm:$0xf] %vm293_vm1, %v352_v56  ;;  %v222_v61 = vadd.f32 %v523_v16, %v221_v58  ;;  %v411_v62 = vpop.f32.mrb[9].mxu1 }
 0x107   :  { %v192_v63 = vpop.f32.mrb[10].mxu0  ;;  %v224_v0 = vpop.f32.mrb[10].mxu1 }
 0x108   :  { %v231_v1 = vmax.f32 %v190_v59, 0.0  ;;  %v193_v2 = vadd.f32 %v523_v16, %v192_v63  ;;  %v396_v3 = vpop.f32.mrb[11].mxu0  ;;  %v239_v4 = vmax.f32 %v222_v61, 0.0  ;;  %v412_v5 = vpop.f32.mrb[11].mxu1 }
 0x10a   :  { %v345_v6 = vpack.c.bf16 %v231_v1, %v231_v1  ;;  %v232_v7 = vmax.f32 %v193_v2, 0.0  ;;  %v353_v8 = vpack.c.bf16 %v239_v4, %v239_v4 }
 0x10c   :  { %298 = vst.msk [vmem:[%s592_s3 + $0x10] sm:$0xf] %vm293_vm1, %v345_v6  ;;  %v346_v9 = vpack.c.bf16 %v232_v7, %v232_v7 }
 0x10d   :  { %307 = vst.msk [vmem:[%s592_s3 + $0x30] sm:$0x1] %vm306_vm2, %v353_v8  ;;  %v197_v10 = vpop.f32.mrb[12].mxu0 }
 0x10e   :  { %299 = vst.msk [vmem:[%s592_s3 + $0x14] sm:$0xf] %vm293_vm1, %v346_v9  ;;  %v198_v11 = vadd.f32 %v523_v16, %v197_v10  ;;  %v399_v12 = vpop.f32.mrb[13].mxu0 }
 0x10f   :  { %v200_v13 = vpop.f32.mrb[14].mxu0 }
 0x110   :  { %v233_v14 = vmax.f32 %v198_v11, 0.0  ;;  %v201_v15 = vadd.f32 %v523_v16, %v200_v13  ;;  %v400_v17 = vpop.f32.mrb[15].mxu0 }
 0x112   :  { %v347_v18 = vpack.c.bf16 %v233_v14, %v233_v14  ;;  %v234_v19 = vmax.f32 %v201_v15, 0.0 }
 0x114   :  { %300 = vst.msk [vmem:[%s592_s3 + $0x18] sm:$0xf] %vm293_vm1, %v347_v18  ;;  %v348_v20 = vpack.c.bf16 %v234_v19, %v234_v19 }
 0x116   :  { %301 = vst.msk [vmem:[%s592_s3 + $0x1c] sm:$0xf] %vm293_vm1, %v348_v20 }

// kernel: autoencoder_forward.9
= control target key start
LH: loop header
LB: loop body
LE: loop exit
PB: predicated region body
PF: predicated region fallthrough
CT: control target
= control target key end

     0   :  { %s555_s12 = smov 0   ;;  %s595_s0 = inlined_call_operand.vmem [shape: bf16[392,64], index: 0, kind: input, shape index: {}]   ;;  %s596_s1 = inlined_call_operand.vmem [shape: bf16[64,128], index: 1, kind: input, shape index: {}]   ;;  %s597_s2 = inlined_call_operand.vmem [shape: f32[1,128], index: 2, kind: input, shape index: {}]   ;;  %s598_s3 = inlined_call_operand.vmem [shape: f32[392,4], index: 3, kind: output, shape index: {}]  }
   0x1 LB: > { %s422_s13 = sadd.s32 4294967295, %s533_s12   ;;  %p426_p0 = scmp.ge.s32.totalorder %s533_s12, 1  ;;  %s533_s12 = sphi %s555_s12, %s13_s12  }
   0x2   : > { %p138_p1 = scmp.lt.s32.totalorder %s533_s12, 8 }
   0x4   : > { %p139_p2 = pnand %p426_p0, %p138_p1 }
   0x5   : > { %v491_v0 = vld [vmem:[%s596_s1] sm:$0xff] (!%p139_p2)   ;;  %s162_s16 = smul.u32 (!%p139_p2), 7, %s422_s13  ;;  %v492_v1 = vld [vmem:[%s596_s1 + $0x8] sm:$0xff] (!%p139_p2)   ;;  %v493_v2 = vld [vmem:[%s596_s1 + $0x10] sm:$0xff] (!%p139_p2)   ;;  %vm239_vm0 = vcmask (!%p139_p2), 523264   ;;  %vm358_vm1 = vcmask (!%p139_p2), 31744  }
   0x6   : > { %142 = sbr.rel (%p139_p2) target bundleno = 269 (0x10d), region = 32  ;;  %459 = vmatprep.subr.bf16.mxu0 (!%p139_p2), %v491_v0  ;;  %475 = vmatprep.subr.bf16.mxu1 (!%p139_p2), %v491_v0  ;;  %v494_v3 = vld [vmem:[%s596_s1 + $0x18] sm:$0xff] (!%p139_p2)   ;;  %v429_v8 = vld [vmem:[%s597_s2] ss:$0 sm:$0xff] (!%p139_p2) }
   0x7   : > { %p163_p3 = scmp.lt.s32.totalorder (!%p139_p2), %s162_s16, 48  ;;  %460 = vmatpush3.bf16.msra.mxu0 (!%p139_p2), %v491_v0  ;;  %479 = vmatpush3.bf16.msra.mxu1 (!%p139_p2), %v491_v0 }
   0x8   : > { %461 = vmatprep.subr.bf16.mxu0 (!%p139_p2), %v492_v1  ;;  %476 = vmatprep.subr.bf16.mxu1 (!%p139_p2), %v492_v1 }
   0xb   : > { %462 = vmatpush3.bf16.msra.mxu0 (!%p139_p2), %v492_v1  ;;  %480 = vmatpush3.bf16.msra.mxu1 (!%p139_p2), %v492_v1 }
   0xc   : > { %463 = vmatprep.subr.bf16.mxu0 (!%p139_p2), %v493_v2  ;;  %477 = vmatprep.subr.bf16.mxu1 (!%p139_p2), %v493_v2 }
   0xd   : > { %s600_s16 = smov (!%p163_p3, %s162_s16), 48 }
   0xe   : > { %s427_s21 = sshll.u32 %s600_s16, 2  ;;  %s428_s29 = sshll.u32 %s600_s16, 3 }
   0xf   : > { %s166_s26 = scalar_lea.vmem %s595_s0, %s427_s21  ;;  %464 = vmatpush3.bf16.msra.mxu0 %v493_v2  ;;  %481 = vmatpush3.bf16.msra.mxu1 %v493_v2  ;;  %s172_s5 = scalar_lea.vmem %s598_s3, %s428_s29 }
  0x10   : > { %v495_v4 = vld [vmem:[%s166_s26] sm:$0xff]   ;;  %v496_v5 = vld [vmem:[%s166_s26 + $0x10] sm:$0xff]   ;;  %465 = vmatprep.subr.bf16.mxu0 %v494_v3  ;;  %478 = vmatprep.subr.bf16.mxu1 %v494_v3  ;;  %v497_v6 = vld [vmem:[%s166_s26 + $0x8] sm:$0xff]  }
  0x11   : > { %467 = vmatprep.mubr.msk.bf16.mxu0 %vm239_vm0, %v495_v4  ;;  %471 = vmatprep.mubr.msk.bf16.mxu1 %vm239_vm0, %v496_v5  ;;  %v498_v7 = vld [vmem:[%s166_s26 + $0x18] ss:$0 sps:$4 sm:$0xff]  }
  0x13   : > { %466 = vmatpush3.bf16.msra.mxu0 %v494_v3  ;;  %482 = vmatpush3.bf16.msra.mxu1 %v494_v3 }
  0x16   : > { %468 = vmatmul.mubr.msk.bf16.vlgmr.msra.gmra.mrb[0].mxu0 %vm239_vm0, %v497_v6  ;;  %472 = vmatmul.mubr.msk.bf16.vlgmr.msra.gmra.mrb[0].mxu1 %vm239_vm0, %v498_v7 }
  0xe9   : > { %v469_v9 = vpop.f32.mrb[0].mxu0  ;;  %v473_v10 = vpop.f32.mrb[0].mxu1 }
  0xea   : > { %v295_v11 = vadd.f32 %v469_v9, %v429_v8  ;;  %v311_v12 = vadd.f32 %v473_v10, %v429_v8  ;;  %v286_v13 = vpop.f32.mrb[1].mxu0  ;;  %v302_v14 = vpop.f32.mrb[1].mxu1 }
  0xeb   : > { %v287_v15 = vadd.f32 %v429_v8, %v286_v13  ;;  %v303_v16 = vadd.f32 %v429_v8, %v302_v14  ;;  %v470_v17 = vpop.f32.mrb[2].mxu0  ;;  %v474_v18 = vpop.f32.mrb[2].mxu1 }
  0xec   : > { %v444_v19 = vmul.f32 -1.442695, %v295_v11  ;;  %v448_v20 = vmul.f32 -1.442695, %v311_v12  ;;  %v298_v21 = vadd.f32 %v470_v17, %v429_v8  ;;  %v289_v22 = vpop.f32.mrb[3].mxu0  ;;  %v305_v23 = vpop.f32.mrb[3].mxu1 }
  0xed   : > { %v442_v24 = vmul.f32 -1.442695, %v287_v15  ;;  %v446_v25 = vmul.f32 -1.442695, %v303_v16  ;;  %v290_v26 = vadd.f32 %v429_v8, %v289_v22  ;;  %v306_v27 = vadd.f32 %v429_v8, %v305_v23 }
  0xee   : > { %499 = vpow2.f32 %v444_v19  ;;  %v445_v28 = vmul.f32 -1.442695, %v298_v21 }
  0xef   : > { %501 = vpow2.f32 %v448_v20  ;;  %v443_v29 = vmul.f32 -1.442695, %v290_v26  ;;  %v447_v30 = vmul.f32 -1.442695, %v306_v27 }
  0xf0   : > { %503 = vpow2.f32 %v442_v24 }
  0xf1   : > { %505 = vpow2.f32 %v446_v25 }
  0xf2   : > { %507 = vpow2.f32 %v445_v28 }
  0xf3   : > { %509 = vpow2.f32 %v443_v29 }
  0xf4   : > { %511 = vpow2.f32 %v447_v30 }
  0xf8   : > { %v500_v31 = vpop.eup %499 }
  0xf9   : > { %v502_v32 = vpop.eup %501  ;;  %v339_v33 = vadd.f32 1.0, %v500_v31 }
  0xfa   : > { %v504_v34 = vpop.eup %503  ;;  %v343_v35 = vadd.f32 1.0, %v502_v32 }
  0xfb   : > { %v506_v36 = vpop.eup %505  ;;  %513 = vrcp.f32 %v339_v33  ;;  %v337_v37 = vadd.f32 1.0, %v504_v34 }
  0xfc   : > { %v508_v38 = vpop.eup %507  ;;  %515 = vrcp.f32 %v343_v35  ;;  %v341_v39 = vadd.f32 1.0, %v506_v36 }
  0xfd   : > { %v510_v40 = vpop.eup %509  ;;  %517 = vrcp.f32 %v337_v37  ;;  %v340_v41 = vadd.f32 1.0, %v508_v38 }
  0xfe   : > { %v512_v42 = vpop.eup %511  ;;  %519 = vrcp.f32 %v341_v39  ;;  %v338_v43 = vadd.f32 1.0, %v510_v40 }
  0xff   : > { %521 = vrcp.f32 %v340_v41  ;;  %v342_v44 = vadd.f32 1.0, %v512_v42 }
 0x100   : > { %523 = vrcp.f32 %v338_v43 }
 0x101   : > { %525 = vrcp.f32 %v342_v44 }
 0x105   : > { %v514_v45 = vpop.eup %513 }
 0x106   : > { %v516_v46 = vpop.eup %515  ;;  %361 = vst.msk [vmem:[%s172_s5 + $0x10] sm:$0xff] %vm358_vm1, %v514_v45 }
 0x107   : > { %v518_v47 = vpop.eup %517  ;;  %365 = vst.msk [vmem:[%s172_s5 + $0x30] sm:$0xff] %vm358_vm1, %v516_v46 }
 0x108   : > { %v520_v48 = vpop.eup %519  ;;  %359 = vst.msk [vmem:[%s172_s5] sm:$0xff] %vm358_vm1, %v518_v47 }
 0x109   : > { %v522_v49 = vpop.eup %521  ;;  %363 = vst.msk [vmem:[%s172_s5 + $0x20] sm:$0xff] %vm358_vm1, %v520_v48 }
 0x10a   : > { %v524_v50 = vpop.eup %523  ;;  %362 = vst.msk [vmem:[%s172_s5 + $0x18] sm:$0xff] %vm358_vm1, %v522_v49 }
 0x10b   : > { %v526_v51 = vpop.eup %525  ;;  %360 = vst.msk [vmem:[%s172_s5 + $0x8] sm:$0xff] %vm358_vm1, %v524_v50 }
 0x10c   : > { %364 = vst.msk [vmem:[%s172_s5 + $0x28] sm:$0xff] %vm358_vm1, %v526_v51 }
 0x10d PF: > { %s13_s12 = sadd.s32 1, %s533_s12  }
 0x10e   : > { %p10_p4 = scmp.ge.s32.totalorder %s13_s12, 9  }
 0x110   :  { %12 = sbr.rel (!%p10_p4) target bundleno = 1 (0x1), region = 62 }

</bundles_post_ra>
